<compile_context>
chip_gen: v6e
topology: v6e:2x2x1
jax: 0.10.0
libtpu: 0.0.40
codegen_flags: <defaults>
</compile_context>

<pallas_src>
import functools

import jax
import jax.numpy as jnp
from jax import lax
from jax.experimental import pallas as pl
from jax.experimental.pallas import tpu as pltpu

BN_EPS = 1e-5


def _round_up(x, m):
    return (x + m - 1) // m * m


def _pick_rows_per_chunk(n, ho, wo, target_m):
    """Largest row-chunk with rows | Ho and rows*Wo % 128 == 0 that fits target_m;
    falls back to the whole image (block == full dim, always legal)."""
    valid = [r for r in range(1, ho + 1) if ho % r == 0 and (r * wo) % 128 == 0]
    if not valid:
        return ho
    fitting = [r for r in valid if r * wo <= target_m]
    r = max(fitting) if fitting else min(valid)
    # Keep at least 2 total grid steps so both v7x TensorCores get work.
    while n * (ho // r) < 2:
        smaller = [v for v in valid if v < r]
        if not smaller:
            break
        r = max(smaller)
    return r


# ---------------------------------------------------------------------------
# In-kernel fused im2col + conv tile (shared by both passes)
# ---------------------------------------------------------------------------
def _conv_tile(slab_ref, w_ref, row_start, *, rows, wo, kh, kw, stride, c_pad):
    """fp32 conv-output tile of shape (rows*wo, Cp) via kh*kw per-tap MXU matmuls."""
    chunk_m = rows * wo
    acc = None
    for i in range(kh):
        for j in range(kw):
            phase = (i % stride) * stride + (j % stride)   # static Python int
            qi, qj = i // stride, j // stride               # static Python ints
            tap = slab_ref[0, phase,
                           pl.ds(row_start + qi, rows),
                           pl.ds(qj, wo), :]                # (rows, wo, c_pad)
            part = jnp.dot(tap.reshape(chunk_m, c_pad), w_ref[i * kw + j],
                           preferred_element_type=jnp.float32)
            acc = part if acc is None else acc + part
    return acc


# ---------------------------------------------------------------------------
# Pass 1: conv (recomputed, never stored) -> per-tile partial BN statistics
# ---------------------------------------------------------------------------
def _conv_stats_kernel(slab_ref, w_ref, stats_ref, *, rows, wo, kh, kw, stride, c_pad):
    row_start = pl.program_id(1) * rows
    acc = _conv_tile(slab_ref, w_ref, row_start, rows=rows, wo=wo, kh=kh, kw=kw,
                     stride=stride, c_pad=c_pad)
    stats_ref[0] = jnp.concatenate(
        [jnp.sum(acc, axis=0, keepdims=True),
         jnp.sum(acc * acc, axis=0, keepdims=True)], axis=0)


# ---------------------------------------------------------------------------
# Pass 2: conv (recomputed) -> BN scale/shift -> ReLU -> NCHW-flat store
# ---------------------------------------------------------------------------
def _conv_bn_relu_kernel(slab_ref, w_ref, scale_ref, shift_ref, out_ref, *,
                         rows, wo, kh, kw, stride, c_pad):
    row_start = pl.program_id(1) * rows
    acc = _conv_tile(slab_ref, w_ref, row_start, rows=rows, wo=wo, kh=kh, kw=kw,
                     stride=stride, c_pad=c_pad)
    y = jnp.maximum(acc * scale_ref[...] + shift_ref[...], 0.0)     # (chunk_m, Cp)
    out_ref[0] = jnp.transpose(y, (1, 0)).astype(out_ref.dtype)     # (Cp, chunk_m)


@functools.partial(jax.jit, static_argnames=("stride", "padding", "target_chunk_m"))
def conv_block(x, weight, bias, gamma, beta, *, stride, padding, target_chunk_m=1024):
    """x: (N, C_in, H, W) NCHW; weight: (C_out, C_in, KH, KW) OIHW (PyTorch)."""
    del bias  # cancels exactly under train-mode BN mean subtraction
    n, c_in, h, w = x.shape
    c_out, _, kh, kw = weight.shape
    s = stride
    ho = (h + 2 * padding - kh) // s + 1
    wo = (w + 2 * padding - kw) // s + 1

    cp = _round_up(c_out, 128)      # lane-dense output channels
    c_pad = _round_up(c_in, 8)      # sublane-friendly contraction dim

    rows = _pick_rows_per_chunk(n, ho, wo, target_chunk_m)
    n_chunks = ho // rows
    chunk_m = rows * wo
    mp = ho * wo

    # ---- host prep (all input-sized; no patches blow-up) -------------------
    # NCHW -> NHWC, zero-pad spatially + on C, phase-decompose for stride>1 so the
    # kernel only needs unit-stride slices.  stride==1 => a single trivial phase.
    x_nhwc = jnp.transpose(x, (0, 2, 3, 1))
    hq = ho + (kh - 1) // s
    wq = wo + (kw - 1) // s
    pad_b = max(0, s * hq - h - padding)
    pad_r = max(0, s * wq - w - padding)
    x_pad = jnp.pad(x_nhwc, ((0, 0), (padding, pad_b), (padding, pad_r),
                             (0, c_pad - c_in)))
    phases = []
    for ri in range(s):
        for rj in range(s):
            phases.append(x_pad[:, ri::s, rj::s, :][:, :hq, :wq, :])
    slab = jnp.stack(phases, axis=1)                      # (N, s*s, hq, wq, c_pad)

    # OIHW -> (kh*kw, C_in, C_out), matching the in-kernel tap ordering; pad channels.
    w_taps = jnp.transpose(weight, (2, 3, 1, 0)).reshape(kh * kw, c_in, c_out)
    w_taps = jnp.pad(w_taps, ((0, 0), (0, c_pad - c_in), (0, cp - c_out)))
    gamma_p = jnp.pad(gamma, (0, cp - c_out))
    beta_p = jnp.pad(beta, (0, cp - c_out))

    # ---- specs / compiler params -------------------------------------------
    slab_spec = pl.BlockSpec((1, s * s, hq, wq, c_pad), lambda nb, rc: (nb, 0, 0, 0, 0))
    w_spec = pl.BlockSpec((kh * kw, c_pad, cp), lambda nb, rc: (0, 0, 0))
    vec_spec = pl.BlockSpec((1, cp), lambda nb, rc: (0, 0))

    slab_block_bytes = (s * s) * hq * wq * c_pad * 4
    w_bytes = kh * kw * c_pad * cp * 4
    out_block_bytes = chunk_m * cp * 4
    est_vmem = 2 * slab_block_bytes + 2 * w_bytes + 3 * out_block_bytes + (1 << 20)
    cp_kwargs = dict(dimension_semantics=("parallel", "parallel"))
    if est_vmem > 30 * 1024 * 1024:
        # raise the scoped-VMEM allowance for big layers (v7x physical cap is 64 MiB)
        cp_kwargs["vmem_limit_bytes"] = int(min(est_vmem * 1.5, 100 * 1024 * 1024))
    cparams = pltpu.CompilerParams(**cp_kwargs)

    kern_statics = dict(rows=rows, wo=wo, kh=kh, kw=kw, stride=s, c_pad=c_pad)

    # ---- Pass 1: fused im2col + matmul -> per-tile (sum, sumsq) ------------
    stats = pl.pallas_call(
        functools.partial(_conv_stats_kernel, **kern_statics),
        out_shape=jax.ShapeDtypeStruct((n * n_chunks, 2, cp), jnp.float32),
        grid=(n, n_chunks),
        in_specs=[slab_spec, w_spec],
        out_specs=pl.BlockSpec((1, 2, cp), lambda nb, rc: (nb * n_chunks + rc, 0, 0)),
        compiler_params=cparams,
    )(slab, w_taps)

    # ---- tiny cross-tile reduction + per-channel scale/shift (XLA) ---------
    # Padded channels: zero weights & zero gamma/beta -> scale = shift = 0 (no NaNs).
    m_total = n * ho * wo
    mean = jnp.sum(stats[:, 0, :], axis=0) / m_total
    var = jnp.maximum(jnp.sum(stats[:, 1, :], axis=0) / m_total - mean * mean, 0.0)
    scale_v = gamma_p * lax.rsqrt(var + BN_EPS)
    shift_v = beta_p - mean * scale_v
    scale = scale_v.reshape(1, cp)
    shift = shift_v.reshape(1, cp)

    # ---- Pass 2: fused im2col + matmul (recomputed) + BN + ReLU ------------
    out_cm = pl.pallas_call(
        functools.partial(_conv_bn_relu_kernel, **kern_statics),
        out_shape=jax.ShapeDtypeStruct((n, cp, mp), jnp.float32),
        grid=(n, n_chunks),
        in_specs=[slab_spec, w_spec, vec_spec, vec_spec],
        out_specs=pl.BlockSpec((1, cp, chunk_m), lambda nb, rc: (nb, 0, rc)),
        compiler_params=cparams,
    )(slab, w_taps, scale, shift)

    # NCHW-flat -> NCHW: only a channel slice + minor-dim split, no transpose pass.
    return out_cm[:, :c_out, :].reshape(n, c_out, ho, wo)


def reference(x, weight, bias, gamma, beta, *, stride, padding):
    y = lax.conv_general_dilated(
        x, weight, window_strides=(stride, stride),
        padding=[(padding, padding), (padding, padding)],
        dimension_numbers=("NCHW", "OIHW", "NCHW"),
    ) + bias.reshape(1, -1, 1, 1)
    mean = jnp.mean(y, axis=(0, 2, 3), keepdims=True)
    var = jnp.mean((y - mean) ** 2, axis=(0, 2, 3), keepdims=True)
    y = (y - mean) * lax.rsqrt(var + BN_EPS)
    y = y * gamma.reshape(1, -1, 1, 1) + beta.reshape(1, -1, 1, 1)
    return jnp.maximum(y, 0.0)


if __name__ == "__main__":
    # ConvBlock(in_channels=4, out_channels=8, kernel_size=3, stride=1, padding=1)
    N, C_IN, H, W = 2, 4, 16, 16
    C_OUT, KH, KW = 8, 3, 3
    STRIDE, PAD = 1, 1

    key = jax.random.PRNGKey(0)
    kx, kw_, kb, kg, kbt = jax.random.split(key, 5)
    x = jax.random.normal(kx, (N, C_IN, H, W), dtype=jnp.float32)
    weight = 0.1 * jax.random.normal(kw_, (C_OUT, C_IN, KH, KW), dtype=jnp.float32)
    bias = 0.1 * jax.random.normal(kb, (C_OUT,), dtype=jnp.float32)
    gamma = 1.0 + 0.1 * jax.random.normal(kg, (C_OUT,), dtype=jnp.float32)
    beta = 0.1 * jax.random.normal(kbt, (C_OUT,), dtype=jnp.float32)

    # target_chunk_m=128 -> 2 row-chunks per image (grid (2, 2)), exercising the
    # resident-slab multi-chunk path and the cross-tile BN stats reduction
    # (default 1024 for realistic shapes).
    out = conv_block(x, weight, bias, gamma, beta, stride=STRIDE, padding=PAD,
                     target_chunk_m=128)
    out = jax.block_until_ready(out)

    ref = reference(x, weight, bias, gamma, beta, stride=STRIDE, padding=PAD)
    assert out.shape == (N, C_OUT, H, W)
    assert jnp.allclose(out, ref, atol=1e-4, rtol=1e-4), "mismatch vs reference"
    print("KERNEL_OK")
</pallas_src>

<mosaic_0001>
module attributes {stable_mosaic.version = 11 : i64} {
  func.func @_conv_stats_kernel(%arg0: i32, %arg1: i32, %arg2: memref<1x1x18x18x8xf32, #tpu.memory_space<vmem>>, %arg3: memref<9x8x128xf32, #tpu.memory_space<vmem>>, %arg4: memref<1x2x128xf32, #tpu.memory_space<vmem>>) attributes {dimension_semantics = [#tpu.dimension_semantics<parallel>, #tpu.dimension_semantics<parallel>], iteration_bounds = array<i64: 2, 2>, scalar_prefetch = 0 : i64, scratch_operands = 0 : i64, tpu.core_type = #tpu.core_type<tc>, window_params = [{transform_indices = @transform_0, window_bounds = array<i64: 1, 1, 18, 18, 8>}, {pipeline_mode = #tpu.pipeline_mode<synchronous>, transform_indices = @transform_1, window_bounds = array<i64: 9, 8, 128>}, {transform_indices = @transform_2, window_bounds = array<i64: 1, 2, 128>}]} {
    %c8_i32 = arith.constant 8 : i32
    %0 = arith.muli %arg1, %c8_i32 : i32
    %c0_i32 = arith.constant 0 : i32
    %1 = arith.addi %0, %c0_i32 : i32
    %c0 = arith.constant 0 : index
    %c0_0 = arith.constant 0 : index
    %2 = arith.index_cast %1 : i32 to index
    %c0_1 = arith.constant 0 : index
    %c0_2 = arith.constant 0 : index
    %3 = vector.load %arg2[%c0, %c0_0, %2, %c0_1, %c0_2] : memref<1x1x18x18x8xf32, #tpu.memory_space<vmem>>, vector<1x1x8x16x8xf32>
    %4 = vector.shape_cast %3 : vector<1x1x8x16x8xf32> to vector<8x16x8xf32>
    %5 = vector.shape_cast %4 : vector<8x16x8xf32> to vector<128x8xf32>
    %c0_3 = arith.constant 0 : index
    %c0_4 = arith.constant 0 : index
    %c0_5 = arith.constant 0 : index
    %6 = vector.load %arg3[%c0_3, %c0_4, %c0_5] : memref<9x8x128xf32, #tpu.memory_space<vmem>>, vector<1x8x128xf32>
    %7 = vector.shape_cast %6 : vector<1x8x128xf32> to vector<8x128xf32>
    %cst = arith.constant dense<0.000000e+00> : vector<128x128xf32>
    %8 = tpu.matmul %5, %7, %cst {dimension_numbers = #tpu.dot_dimension_numbers<[1], [0], [0], [1], [0, 0, 1, 1], [], []>} : vector<128x8xf32>, vector<8x128xf32>, vector<128x128xf32> -> vector<128x128xf32>
    %c0_i32_6 = arith.constant 0 : i32
    %9 = arith.addi %0, %c0_i32_6 : i32
    %c0_7 = arith.constant 0 : index
    %c0_8 = arith.constant 0 : index
    %10 = arith.index_cast %9 : i32 to index
    %c1 = arith.constant 1 : index
    %c0_9 = arith.constant 0 : index
    %11 = vector.load %arg2[%c0_7, %c0_8, %10, %c1, %c0_9] : memref<1x1x18x18x8xf32, #tpu.memory_space<vmem>>, vector<1x1x8x16x8xf32>
    %12 = vector.shape_cast %11 : vector<1x1x8x16x8xf32> to vector<8x16x8xf32>
    %13 = vector.shape_cast %12 : vector<8x16x8xf32> to vector<128x8xf32>
    %c1_10 = arith.constant 1 : index
    %c0_11 = arith.constant 0 : index
    %c0_12 = arith.constant 0 : index
    %14 = vector.load %arg3[%c1_10, %c0_11, %c0_12] : memref<9x8x128xf32, #tpu.memory_space<vmem>>, vector<1x8x128xf32>
    %15 = vector.shape_cast %14 : vector<1x8x128xf32> to vector<8x128xf32>
    %cst_13 = arith.constant dense<0.000000e+00> : vector<128x128xf32>
    %16 = tpu.matmul %13, %15, %cst_13 {dimension_numbers = #tpu.dot_dimension_numbers<[1], [0], [0], [1], [0, 0, 1, 1], [], []>} : vector<128x8xf32>, vector<8x128xf32>, vector<128x128xf32> -> vector<128x128xf32>
    %17 = arith.addf %8, %16 : vector<128x128xf32>
    %c0_i32_14 = arith.constant 0 : i32
    %18 = arith.addi %0, %c0_i32_14 : i32
    %c0_15 = arith.constant 0 : index
    %c0_16 = arith.constant 0 : index
    %19 = arith.index_cast %18 : i32 to index
    %c2 = arith.constant 2 : index
    %c0_17 = arith.constant 0 : index
    %20 = vector.load %arg2[%c0_15, %c0_16, %19, %c2, %c0_17] : memref<1x1x18x18x8xf32, #tpu.memory_space<vmem>>, vector<1x1x8x16x8xf32>
    %21 = vector.shape_cast %20 : vector<1x1x8x16x8xf32> to vector<8x16x8xf32>
    %22 = vector.shape_cast %21 : vector<8x16x8xf32> to vector<128x8xf32>
    %c2_18 = arith.constant 2 : index
    %c0_19 = arith.constant 0 : index
    %c0_20 = arith.constant 0 : index
    %23 = vector.load %arg3[%c2_18, %c0_19, %c0_20] : memref<9x8x128xf32, #tpu.memory_space<vmem>>, vector<1x8x128xf32>
    %24 = vector.shape_cast %23 : vector<1x8x128xf32> to vector<8x128xf32>
    %cst_21 = arith.constant dense<0.000000e+00> : vector<128x128xf32>
    %25 = tpu.matmul %22, %24, %cst_21 {dimension_numbers = #tpu.dot_dimension_numbers<[1], [0], [0], [1], [0, 0, 1, 1], [], []>} : vector<128x8xf32>, vector<8x128xf32>, vector<128x128xf32> -> vector<128x128xf32>
    %26 = arith.addf %17, %25 : vector<128x128xf32>
    %c1_i32 = arith.constant 1 : i32
    %27 = arith.addi %0, %c1_i32 : i32
    %c0_22 = arith.constant 0 : index
    %c0_23 = arith.constant 0 : index
    %28 = arith.index_cast %27 : i32 to index
    %c0_24 = arith.constant 0 : index
    %c0_25 = arith.constant 0 : index
    %29 = vector.load %arg2[%c0_22, %c0_23, %28, %c0_24, %c0_25] : memref<1x1x18x18x8xf32, #tpu.memory_space<vmem>>, vector<1x1x8x16x8xf32>
    %30 = vector.shape_cast %29 : vector<1x1x8x16x8xf32> to vector<8x16x8xf32>
    %31 = vector.shape_cast %30 : vector<8x16x8xf32> to vector<128x8xf32>
    %c3 = arith.constant 3 : index
    %c0_26 = arith.constant 0 : index
    %c0_27 = arith.constant 0 : index
    %32 = vector.load %arg3[%c3, %c0_26, %c0_27] : memref<9x8x128xf32, #tpu.memory_space<vmem>>, vector<1x8x128xf32>
    %33 = vector.shape_cast %32 : vector<1x8x128xf32> to vector<8x128xf32>
    %cst_28 = arith.constant dense<0.000000e+00> : vector<128x128xf32>
    %34 = tpu.matmul %31, %33, %cst_28 {dimension_numbers = #tpu.dot_dimension_numbers<[1], [0], [0], [1], [0, 0, 1, 1], [], []>} : vector<128x8xf32>, vector<8x128xf32>, vector<128x128xf32> -> vector<128x128xf32>
    %35 = arith.addf %26, %34 : vector<128x128xf32>
    %c1_i32_29 = arith.constant 1 : i32
    %36 = arith.addi %0, %c1_i32_29 : i32
    %c0_30 = arith.constant 0 : index
    %c0_31 = arith.constant 0 : index
    %37 = arith.index_cast %36 : i32 to index
    %c1_32 = arith.constant 1 : index
    %c0_33 = arith.constant 0 : index
    %38 = vector.load %arg2[%c0_30, %c0_31, %37, %c1_32, %c0_33] : memref<1x1x18x18x8xf32, #tpu.memory_space<vmem>>, vector<1x1x8x16x8xf32>
    %39 = vector.shape_cast %38 : vector<1x1x8x16x8xf32> to vector<8x16x8xf32>
    %40 = vector.shape_cast %39 : vector<8x16x8xf32> to vector<128x8xf32>
    %c4 = arith.constant 4 : index
    %c0_34 = arith.constant 0 : index
    %c0_35 = arith.constant 0 : index
    %41 = vector.load %arg3[%c4, %c0_34, %c0_35] : memref<9x8x128xf32, #tpu.memory_space<vmem>>, vector<1x8x128xf32>
    %42 = vector.shape_cast %41 : vector<1x8x128xf32> to vector<8x128xf32>
    %cst_36 = arith.constant dense<0.000000e+00> : vector<128x128xf32>
    %43 = tpu.matmul %40, %42, %cst_36 {dimension_numbers = #tpu.dot_dimension_numbers<[1], [0], [0], [1], [0, 0, 1, 1], [], []>} : vector<128x8xf32>, vector<8x128xf32>, vector<128x128xf32> -> vector<128x128xf32>
    %44 = arith.addf %35, %43 : vector<128x128xf32>
    %c1_i32_37 = arith.constant 1 : i32
    %45 = arith.addi %0, %c1_i32_37 : i32
    %c0_38 = arith.constant 0 : index
    %c0_39 = arith.constant 0 : index
    %46 = arith.index_cast %45 : i32 to index
    %c2_40 = arith.constant 2 : index
    %c0_41 = arith.constant 0 : index
    %47 = vector.load %arg2[%c0_38, %c0_39, %46, %c2_40, %c0_41] : memref<1x1x18x18x8xf32, #tpu.memory_space<vmem>>, vector<1x1x8x16x8xf32>
    %48 = vector.shape_cast %47 : vector<1x1x8x16x8xf32> to vector<8x16x8xf32>
    %49 = vector.shape_cast %48 : vector<8x16x8xf32> to vector<128x8xf32>
    %c5 = arith.constant 5 : index
    %c0_42 = arith.constant 0 : index
    %c0_43 = arith.constant 0 : index
    %50 = vector.load %arg3[%c5, %c0_42, %c0_43] : memref<9x8x128xf32, #tpu.memory_space<vmem>>, vector<1x8x128xf32>
    %51 = vector.shape_cast %50 : vector<1x8x128xf32> to vector<8x128xf32>
    %cst_44 = arith.constant dense<0.000000e+00> : vector<128x128xf32>
    %52 = tpu.matmul %49, %51, %cst_44 {dimension_numbers = #tpu.dot_dimension_numbers<[1], [0], [0], [1], [0, 0, 1, 1], [], []>} : vector<128x8xf32>, vector<8x128xf32>, vector<128x128xf32> -> vector<128x128xf32>
    %53 = arith.addf %44, %52 : vector<128x128xf32>
    %c2_i32 = arith.constant 2 : i32
    %54 = arith.addi %0, %c2_i32 : i32
    %c0_45 = arith.constant 0 : index
    %c0_46 = arith.constant 0 : index
    %55 = arith.index_cast %54 : i32 to index
    %c0_47 = arith.constant 0 : index
    %c0_48 = arith.constant 0 : index
    %56 = vector.load %arg2[%c0_45, %c0_46, %55, %c0_47, %c0_48] : memref<1x1x18x18x8xf32, #tpu.memory_space<vmem>>, vector<1x1x8x16x8xf32>
    %57 = vector.shape_cast %56 : vector<1x1x8x16x8xf32> to vector<8x16x8xf32>
    %58 = vector.shape_cast %57 : vector<8x16x8xf32> to vector<128x8xf32>
    %c6 = arith.constant 6 : index
    %c0_49 = arith.constant 0 : index
    %c0_50 = arith.constant 0 : index
    %59 = vector.load %arg3[%c6, %c0_49, %c0_50] : memref<9x8x128xf32, #tpu.memory_space<vmem>>, vector<1x8x128xf32>
    %60 = vector.shape_cast %59 : vector<1x8x128xf32> to vector<8x128xf32>
    %cst_51 = arith.constant dense<0.000000e+00> : vector<128x128xf32>
    %61 = tpu.matmul %58, %60, %cst_51 {dimension_numbers = #tpu.dot_dimension_numbers<[1], [0], [0], [1], [0, 0, 1, 1], [], []>} : vector<128x8xf32>, vector<8x128xf32>, vector<128x128xf32> -> vector<128x128xf32>
    %62 = arith.addf %53, %61 : vector<128x128xf32>
    %c2_i32_52 = arith.constant 2 : i32
    %63 = arith.addi %0, %c2_i32_52 : i32
    %c0_53 = arith.constant 0 : index
    %c0_54 = arith.constant 0 : index
    %64 = arith.index_cast %63 : i32 to index
    %c1_55 = arith.constant 1 : index
    %c0_56 = arith.constant 0 : index
    %65 = vector.load %arg2[%c0_53, %c0_54, %64, %c1_55, %c0_56] : memref<1x1x18x18x8xf32, #tpu.memory_space<vmem>>, vector<1x1x8x16x8xf32>
    %66 = vector.shape_cast %65 : vector<1x1x8x16x8xf32> to vector<8x16x8xf32>
    %67 = vector.shape_cast %66 : vector<8x16x8xf32> to vector<128x8xf32>
    %c7 = arith.constant 7 : index
    %c0_57 = arith.constant 0 : index
    %c0_58 = arith.constant 0 : index
    %68 = vector.load %arg3[%c7, %c0_57, %c0_58] : memref<9x8x128xf32, #tpu.memory_space<vmem>>, vector<1x8x128xf32>
    %69 = vector.shape_cast %68 : vector<1x8x128xf32> to vector<8x128xf32>
    %cst_59 = arith.constant dense<0.000000e+00> : vector<128x128xf32>
    %70 = tpu.matmul %67, %69, %cst_59 {dimension_numbers = #tpu.dot_dimension_numbers<[1], [0], [0], [1], [0, 0, 1, 1], [], []>} : vector<128x8xf32>, vector<8x128xf32>, vector<128x128xf32> -> vector<128x128xf32>
    %71 = arith.addf %62, %70 : vector<128x128xf32>
    %c2_i32_60 = arith.constant 2 : i32
    %72 = arith.addi %0, %c2_i32_60 : i32
    %c0_61 = arith.constant 0 : index
    %c0_62 = arith.constant 0 : index
    %73 = arith.index_cast %72 : i32 to index
    %c2_63 = arith.constant 2 : index
    %c0_64 = arith.constant 0 : index
    %74 = vector.load %arg2[%c0_61, %c0_62, %73, %c2_63, %c0_64] : memref<1x1x18x18x8xf32, #tpu.memory_space<vmem>>, vector<1x1x8x16x8xf32>
    %75 = vector.shape_cast %74 : vector<1x1x8x16x8xf32> to vector<8x16x8xf32>
    %76 = vector.shape_cast %75 : vector<8x16x8xf32> to vector<128x8xf32>
    %c8 = arith.constant 8 : index
    %c0_65 = arith.constant 0 : index
    %c0_66 = arith.constant 0 : index
    %77 = vector.load %arg3[%c8, %c0_65, %c0_66] : memref<9x8x128xf32, #tpu.memory_space<vmem>>, vector<1x8x128xf32>
    %78 = vector.shape_cast %77 : vector<1x8x128xf32> to vector<8x128xf32>
    %cst_67 = arith.constant dense<0.000000e+00> : vector<128x128xf32>
    %79 = tpu.matmul %76, %78, %cst_67 {dimension_numbers = #tpu.dot_dimension_numbers<[1], [0], [0], [1], [0, 0, 1, 1], [], []>} : vector<128x8xf32>, vector<8x128xf32>, vector<128x128xf32> -> vector<128x128xf32>
    %80 = arith.addf %71, %79 : vector<128x128xf32>
    %cst_68 = arith.constant dense<0.000000e+00> : vector<128xf32>
    %81 = vector.multi_reduction <add>, %80, %cst_68 [0] : vector<128x128xf32> to vector<128xf32>
    %82 = vector.shape_cast %81 : vector<128xf32> to vector<1x128xf32>
    %83 = arith.mulf %80, %80 : vector<128x128xf32>
    %cst_69 = arith.constant dense<0.000000e+00> : vector<128xf32>
    %84 = vector.multi_reduction <add>, %83, %cst_69 [0] : vector<128x128xf32> to vector<128xf32>
    %85 = vector.shape_cast %84 : vector<128xf32> to vector<1x128xf32>
    %86 = tpu.concatenate %82, %85 in 0 : vector<1x128xf32>, vector<1x128xf32> -> vector<2x128xf32>
    %c0_70 = arith.constant 0 : index
    %c0_71 = arith.constant 0 : index
    %c0_72 = arith.constant 0 : index
    %87 = vector.load %arg4[%c0_70, %c0_71, %c0_72] : memref<1x2x128xf32, #tpu.memory_space<vmem>>, vector<1x2x128xf32>
    %88 = vector.shape_cast %87 : vector<1x2x128xf32> to vector<2x128xf32>
    %89 = vector.shape_cast %86 : vector<2x128xf32> to vector<1x2x128xf32>
    tpu.vector_store %arg4[%c0_70, %c0_71, %c0_72], %89 {strides = array<i32>} : memref<1x2x128xf32, #tpu.memory_space<vmem>>, vector<1x2x128xf32>,
    return
  }
  func.func @transform_0(%arg0: i32, %arg1: i32) -> (i32, i32, i32, i32, i32) {
    %c0_i32 = arith.constant 0 : i32
    %c0_i32_0 = arith.constant 0 : i32
    %c0_i32_1 = arith.constant 0 : i32
    %c0_i32_2 = arith.constant 0 : i32
    %c0_i32_3 = arith.constant 0 : i32
    return %arg0, %c0_i32, %c0_i32_0, %c0_i32_1, %c0_i32_2 : i32, i32, i32, i32, i32
  }
  func.func @transform_1(%arg0: i32, %arg1: i32) -> (i32, i32, i32) {
    %c0_i32 = arith.constant 0 : i32
    %c0_i32_0 = arith.constant 0 : i32
    %c0_i32_1 = arith.constant 0 : i32
    %c0_i32_2 = arith.constant 0 : i32
    return %c0_i32, %c0_i32_0, %c0_i32_1 : i32, i32, i32
  }
  func.func @transform_2(%arg0: i32, %arg1: i32) -> (i32, i32, i32) {
    %c2_i32 = arith.constant 2 : i32
    %0 = arith.muli %arg0, %c2_i32 : i32
    %1 = arith.addi %0, %arg1 : i32
    %c0_i32 = arith.constant 0 : i32
    %c0_i32_0 = arith.constant 0 : i32
    %c0_i32_1 = arith.constant 0 : i32
    return %1, %c0_i32, %c0_i32_0 : i32, i32, i32
  }
}

module attributes {stable_mosaic.version = 11 : i64} {
  func.func @_conv_bn_relu_kernel(%arg0: i32, %arg1: i32, %arg2: memref<1x1x18x18x8xf32, #tpu.memory_space<vmem>>, %arg3: memref<9x8x128xf32, #tpu.memory_space<vmem>>, %arg4: memref<1x128xf32, #tpu.memory_space<vmem>>, %arg5: memref<1x128xf32, #tpu.memory_space<vmem>>, %arg6: memref<1x128x128xf32, #tpu.memory_space<vmem>>) attributes {dimension_semantics = [#tpu.dimension_semantics<parallel>, #tpu.dimension_semantics<parallel>], iteration_bounds = array<i64: 2, 2>, scalar_prefetch = 0 : i64, scratch_operands = 0 : i64, tpu.core_type = #tpu.core_type<tc>, window_params = [{transform_indices = @transform_0, window_bounds = array<i64: 1, 1, 18, 18, 8>}, {pipeline_mode = #tpu.pipeline_mode<synchronous>, transform_indices = @transform_1, window_bounds = array<i64: 9, 8, 128>}, {pipeline_mode = #tpu.pipeline_mode<synchronous>, transform_indices = @transform_2, window_bounds = array<i64: 1, 128>}, {pipeline_mode = #tpu.pipeline_mode<synchronous>, transform_indices = @transform_3, window_bounds = array<i64: 1, 128>}, {transform_indices = @transform_4, window_bounds = array<i64: 1, 128, 128>}]} {
    %c8_i32 = arith.constant 8 : i32
    %0 = arith.muli %arg1, %c8_i32 : i32
    %c0_i32 = arith.constant 0 : i32
    %1 = arith.addi %0, %c0_i32 : i32
    %c0 = arith.constant 0 : index
    %c0_0 = arith.constant 0 : index
    %2 = arith.index_cast %1 : i32 to index
    %c0_1 = arith.constant 0 : index
    %c0_2 = arith.constant 0 : index
    %3 = vector.load %arg2[%c0, %c0_0, %2, %c0_1, %c0_2] : memref<1x1x18x18x8xf32, #tpu.memory_space<vmem>>, vector<1x1x8x16x8xf32>
    %4 = vector.shape_cast %3 : vector<1x1x8x16x8xf32> to vector<8x16x8xf32>
    %5 = vector.shape_cast %4 : vector<8x16x8xf32> to vector<128x8xf32>
    %c0_3 = arith.constant 0 : index
    %c0_4 = arith.constant 0 : index
    %c0_5 = arith.constant 0 : index
    %6 = vector.load %arg3[%c0_3, %c0_4, %c0_5] : memref<9x8x128xf32, #tpu.memory_space<vmem>>, vector<1x8x128xf32>
    %7 = vector.shape_cast %6 : vector<1x8x128xf32> to vector<8x128xf32>
    %cst = arith.constant dense<0.000000e+00> : vector<128x128xf32>
    %8 = tpu.matmul %5, %7, %cst {dimension_numbers = #tpu.dot_dimension_numbers<[1], [0], [0], [1], [0, 0, 1, 1], [], []>} : vector<128x8xf32>, vector<8x128xf32>, vector<128x128xf32> -> vector<128x128xf32>
    %c0_i32_6 = arith.constant 0 : i32
    %9 = arith.addi %0, %c0_i32_6 : i32
    %c0_7 = arith.constant 0 : index
    %c0_8 = arith.constant 0 : index
    %10 = arith.index_cast %9 : i32 to index
    %c1 = arith.constant 1 : index
    %c0_9 = arith.constant 0 : index
    %11 = vector.load %arg2[%c0_7, %c0_8, %10, %c1, %c0_9] : memref<1x1x18x18x8xf32, #tpu.memory_space<vmem>>, vector<1x1x8x16x8xf32>
    %12 = vector.shape_cast %11 : vector<1x1x8x16x8xf32> to vector<8x16x8xf32>
    %13 = vector.shape_cast %12 : vector<8x16x8xf32> to vector<128x8xf32>
    %c1_10 = arith.constant 1 : index
    %c0_11 = arith.constant 0 : index
    %c0_12 = arith.constant 0 : index
    %14 = vector.load %arg3[%c1_10, %c0_11, %c0_12] : memref<9x8x128xf32, #tpu.memory_space<vmem>>, vector<1x8x128xf32>
    %15 = vector.shape_cast %14 : vector<1x8x128xf32> to vector<8x128xf32>
    %cst_13 = arith.constant dense<0.000000e+00> : vector<128x128xf32>
    %16 = tpu.matmul %13, %15, %cst_13 {dimension_numbers = #tpu.dot_dimension_numbers<[1], [0], [0], [1], [0, 0, 1, 1], [], []>} : vector<128x8xf32>, vector<8x128xf32>, vector<128x128xf32> -> vector<128x128xf32>
    %17 = arith.addf %8, %16 : vector<128x128xf32>
    %c0_i32_14 = arith.constant 0 : i32
    %18 = arith.addi %0, %c0_i32_14 : i32
    %c0_15 = arith.constant 0 : index
    %c0_16 = arith.constant 0 : index
    %19 = arith.index_cast %18 : i32 to index
    %c2 = arith.constant 2 : index
    %c0_17 = arith.constant 0 : index
    %20 = vector.load %arg2[%c0_15, %c0_16, %19, %c2, %c0_17] : memref<1x1x18x18x8xf32, #tpu.memory_space<vmem>>, vector<1x1x8x16x8xf32>
    %21 = vector.shape_cast %20 : vector<1x1x8x16x8xf32> to vector<8x16x8xf32>
    %22 = vector.shape_cast %21 : vector<8x16x8xf32> to vector<128x8xf32>
    %c2_18 = arith.constant 2 : index
    %c0_19 = arith.constant 0 : index
    %c0_20 = arith.constant 0 : index
    %23 = vector.load %arg3[%c2_18, %c0_19, %c0_20] : memref<9x8x128xf32, #tpu.memory_space<vmem>>, vector<1x8x128xf32>
    %24 = vector.shape_cast %23 : vector<1x8x128xf32> to vector<8x128xf32>
    %cst_21 = arith.constant dense<0.000000e+00> : vector<128x128xf32>
    %25 = tpu.matmul %22, %24, %cst_21 {dimension_numbers = #tpu.dot_dimension_numbers<[1], [0], [0], [1], [0, 0, 1, 1], [], []>} : vector<128x8xf32>, vector<8x128xf32>, vector<128x128xf32> -> vector<128x128xf32>
    %26 = arith.addf %17, %25 : vector<128x128xf32>
    %c1_i32 = arith.constant 1 : i32
    %27 = arith.addi %0, %c1_i32 : i32
    %c0_22 = arith.constant 0 : index
    %c0_23 = arith.constant 0 : index
    %28 = arith.index_cast %27 : i32 to index
    %c0_24 = arith.constant 0 : index
    %c0_25 = arith.constant 0 : index
    %29 = vector.load %arg2[%c0_22, %c0_23, %28, %c0_24, %c0_25] : memref<1x1x18x18x8xf32, #tpu.memory_space<vmem>>, vector<1x1x8x16x8xf32>
    %30 = vector.shape_cast %29 : vector<1x1x8x16x8xf32> to vector<8x16x8xf32>
    %31 = vector.shape_cast %30 : vector<8x16x8xf32> to vector<128x8xf32>
    %c3 = arith.constant 3 : index
    %c0_26 = arith.constant 0 : index
    %c0_27 = arith.constant 0 : index
    %32 = vector.load %arg3[%c3, %c0_26, %c0_27] : memref<9x8x128xf32, #tpu.memory_space<vmem>>, vector<1x8x128xf32>
    %33 = vector.shape_cast %32 : vector<1x8x128xf32> to vector<8x128xf32>
    %cst_28 = arith.constant dense<0.000000e+00> : vector<128x128xf32>
    %34 = tpu.matmul %31, %33, %cst_28 {dimension_numbers = #tpu.dot_dimension_numbers<[1], [0], [0], [1], [0, 0, 1, 1], [], []>} : vector<128x8xf32>, vector<8x128xf32>, vector<128x128xf32> -> vector<128x128xf32>
    %35 = arith.addf %26, %34 : vector<128x128xf32>
    %c1_i32_29 = arith.constant 1 : i32
    %36 = arith.addi %0, %c1_i32_29 : i32
    %c0_30 = arith.constant 0 : index
    %c0_31 = arith.constant 0 : index
    %37 = arith.index_cast %36 : i32 to index
    %c1_32 = arith.constant 1 : index
    %c0_33 = arith.constant 0 : index
    %38 = vector.load %arg2[%c0_30, %c0_31, %37, %c1_32, %c0_33] : memref<1x1x18x18x8xf32, #tpu.memory_space<vmem>>, vector<1x1x8x16x8xf32>
    %39 = vector.shape_cast %38 : vector<1x1x8x16x8xf32> to vector<8x16x8xf32>
    %40 = vector.shape_cast %39 : vector<8x16x8xf32> to vector<128x8xf32>
    %c4 = arith.constant 4 : index
    %c0_34 = arith.constant 0 : index
    %c0_35 = arith.constant 0 : index
    %41 = vector.load %arg3[%c4, %c0_34, %c0_35] : memref<9x8x128xf32, #tpu.memory_space<vmem>>, vector<1x8x128xf32>
    %42 = vector.shape_cast %41 : vector<1x8x128xf32> to vector<8x128xf32>
    %cst_36 = arith.constant dense<0.000000e+00> : vector<128x128xf32>
    %43 = tpu.matmul %40, %42, %cst_36 {dimension_numbers = #tpu.dot_dimension_numbers<[1], [0], [0], [1], [0, 0, 1, 1], [], []>} : vector<128x8xf32>, vector<8x128xf32>, vector<128x128xf32> -> vector<128x128xf32>
    %44 = arith.addf %35, %43 : vector<128x128xf32>
    %c1_i32_37 = arith.constant 1 : i32
    %45 = arith.addi %0, %c1_i32_37 : i32
    %c0_38 = arith.constant 0 : index
    %c0_39 = arith.constant 0 : index
    %46 = arith.index_cast %45 : i32 to index
    %c2_40 = arith.constant 2 : index
    %c0_41 = arith.constant 0 : index
    %47 = vector.load %arg2[%c0_38, %c0_39, %46, %c2_40, %c0_41] : memref<1x1x18x18x8xf32, #tpu.memory_space<vmem>>, vector<1x1x8x16x8xf32>
    %48 = vector.shape_cast %47 : vector<1x1x8x16x8xf32> to vector<8x16x8xf32>
    %49 = vector.shape_cast %48 : vector<8x16x8xf32> to vector<128x8xf32>
    %c5 = arith.constant 5 : index
    %c0_42 = arith.constant 0 : index
    %c0_43 = arith.constant 0 : index
    %50 = vector.load %arg3[%c5, %c0_42, %c0_43] : memref<9x8x128xf32, #tpu.memory_space<vmem>>, vector<1x8x128xf32>
    %51 = vector.shape_cast %50 : vector<1x8x128xf32> to vector<8x128xf32>
    %cst_44 = arith.constant dense<0.000000e+00> : vector<128x128xf32>
    %52 = tpu.matmul %49, %51, %cst_44 {dimension_numbers = #tpu.dot_dimension_numbers<[1], [0], [0], [1], [0, 0, 1, 1], [], []>} : vector<128x8xf32>, vector<8x128xf32>, vector<128x128xf32> -> vector<128x128xf32>
    %53 = arith.addf %44, %52 : vector<128x128xf32>
    %c2_i32 = arith.constant 2 : i32
    %54 = arith.addi %0, %c2_i32 : i32
    %c0_45 = arith.constant 0 : index
    %c0_46 = arith.constant 0 : index
    %55 = arith.index_cast %54 : i32 to index
    %c0_47 = arith.constant 0 : index
    %c0_48 = arith.constant 0 : index
    %56 = vector.load %arg2[%c0_45, %c0_46, %55, %c0_47, %c0_48] : memref<1x1x18x18x8xf32, #tpu.memory_space<vmem>>, vector<1x1x8x16x8xf32>
    %57 = vector.shape_cast %56 : vector<1x1x8x16x8xf32> to vector<8x16x8xf32>
    %58 = vector.shape_cast %57 : vector<8x16x8xf32> to vector<128x8xf32>
    %c6 = arith.constant 6 : index
    %c0_49 = arith.constant 0 : index
    %c0_50 = arith.constant 0 : index
    %59 = vector.load %arg3[%c6, %c0_49, %c0_50] : memref<9x8x128xf32, #tpu.memory_space<vmem>>, vector<1x8x128xf32>
    %60 = vector.shape_cast %59 : vector<1x8x128xf32> to vector<8x128xf32>
    %cst_51 = arith.constant dense<0.000000e+00> : vector<128x128xf32>
    %61 = tpu.matmul %58, %60, %cst_51 {dimension_numbers = #tpu.dot_dimension_numbers<[1], [0], [0], [1], [0, 0, 1, 1], [], []>} : vector<128x8xf32>, vector<8x128xf32>, vector<128x128xf32> -> vector<128x128xf32>
    %62 = arith.addf %53, %61 : vector<128x128xf32>
    %c2_i32_52 = arith.constant 2 : i32
    %63 = arith.addi %0, %c2_i32_52 : i32
    %c0_53 = arith.constant 0 : index
    %c0_54 = arith.constant 0 : index
    %64 = arith.index_cast %63 : i32 to index
    %c1_55 = arith.constant 1 : index
    %c0_56 = arith.constant 0 : index
    %65 = vector.load %arg2[%c0_53, %c0_54, %64, %c1_55, %c0_56] : memref<1x1x18x18x8xf32, #tpu.memory_space<vmem>>, vector<1x1x8x16x8xf32>
    %66 = vector.shape_cast %65 : vector<1x1x8x16x8xf32> to vector<8x16x8xf32>
    %67 = vector.shape_cast %66 : vector<8x16x8xf32> to vector<128x8xf32>
    %c7 = arith.constant 7 : index
    %c0_57 = arith.constant 0 : index
    %c0_58 = arith.constant 0 : index
    %68 = vector.load %arg3[%c7, %c0_57, %c0_58] : memref<9x8x128xf32, #tpu.memory_space<vmem>>, vector<1x8x128xf32>
    %69 = vector.shape_cast %68 : vector<1x8x128xf32> to vector<8x128xf32>
    %cst_59 = arith.constant dense<0.000000e+00> : vector<128x128xf32>
    %70 = tpu.matmul %67, %69, %cst_59 {dimension_numbers = #tpu.dot_dimension_numbers<[1], [0], [0], [1], [0, 0, 1, 1], [], []>} : vector<128x8xf32>, vector<8x128xf32>, vector<128x128xf32> -> vector<128x128xf32>
    %71 = arith.addf %62, %70 : vector<128x128xf32>
    %c2_i32_60 = arith.constant 2 : i32
    %72 = arith.addi %0, %c2_i32_60 : i32
    %c0_61 = arith.constant 0 : index
    %c0_62 = arith.constant 0 : index
    %73 = arith.index_cast %72 : i32 to index
    %c2_63 = arith.constant 2 : index
    %c0_64 = arith.constant 0 : index
    %74 = vector.load %arg2[%c0_61, %c0_62, %73, %c2_63, %c0_64] : memref<1x1x18x18x8xf32, #tpu.memory_space<vmem>>, vector<1x1x8x16x8xf32>
    %75 = vector.shape_cast %74 : vector<1x1x8x16x8xf32> to vector<8x16x8xf32>
    %76 = vector.shape_cast %75 : vector<8x16x8xf32> to vector<128x8xf32>
    %c8 = arith.constant 8 : index
    %c0_65 = arith.constant 0 : index
    %c0_66 = arith.constant 0 : index
    %77 = vector.load %arg3[%c8, %c0_65, %c0_66] : memref<9x8x128xf32, #tpu.memory_space<vmem>>, vector<1x8x128xf32>
    %78 = vector.shape_cast %77 : vector<1x8x128xf32> to vector<8x128xf32>
    %cst_67 = arith.constant dense<0.000000e+00> : vector<128x128xf32>
    %79 = tpu.matmul %76, %78, %cst_67 {dimension_numbers = #tpu.dot_dimension_numbers<[1], [0], [0], [1], [0, 0, 1, 1], [], []>} : vector<128x8xf32>, vector<8x128xf32>, vector<128x128xf32> -> vector<128x128xf32>
    %80 = arith.addf %71, %79 : vector<128x128xf32>
    %c0_68 = arith.constant 0 : index
    %c0_69 = arith.constant 0 : index
    %81 = vector.load %arg4[%c0_68, %c0_69] : memref<1x128xf32, #tpu.memory_space<vmem>>, vector<1x128xf32>
    %82 = vector.broadcast %81 : vector<1x128xf32> to vector<128x128xf32>
    %83 = arith.mulf %80, %82 : vector<128x128xf32>
    %c0_70 = arith.constant 0 : index
    %c0_71 = arith.constant 0 : index
    %84 = vector.load %arg5[%c0_70, %c0_71] : memref<1x128xf32, #tpu.memory_space<vmem>>, vector<1x128xf32>
    %85 = vector.broadcast %84 : vector<1x128xf32> to vector<128x128xf32>
    %86 = arith.addf %83, %85 : vector<128x128xf32>
    %cst_72 = arith.constant 0.000000e+00 : f32
    %87 = vector.broadcast %cst_72 : f32 to vector<128x128xf32>
    %88 = arith.maximumf %86, %87 : vector<128x128xf32>
    %89 = tpu.transpose %88, [1, 0] : vector<128x128xf32> -> vector<128x128xf32>
    %c0_73 = arith.constant 0 : index
    %c0_74 = arith.constant 0 : index
    %c0_75 = arith.constant 0 : index
    %90 = vector.load %arg6[%c0_73, %c0_74, %c0_75] : memref<1x128x128xf32, #tpu.memory_space<vmem>>, vector<1x128x128xf32>
    %91 = vector.shape_cast %90 : vector<1x128x128xf32> to vector<128x128xf32>
    %92 = vector.shape_cast %89 : vector<128x128xf32> to vector<1x128x128xf32>
    tpu.vector_store %arg6[%c0_73, %c0_74, %c0_75], %92 {strides = array<i32>} : memref<1x128x128xf32, #tpu.memory_space<vmem>>, vector<1x128x128xf32>,
    return
  }
  func.func @transform_0(%arg0: i32, %arg1: i32) -> (i32, i32, i32, i32, i32) {
    %c0_i32 = arith.constant 0 : i32
    %c0_i32_0 = arith.constant 0 : i32
    %c0_i32_1 = arith.constant 0 : i32
    %c0_i32_2 = arith.constant 0 : i32
    %c0_i32_3 = arith.constant 0 : i32
    return %arg0, %c0_i32, %c0_i32_0, %c0_i32_1, %c0_i32_2 : i32, i32, i32, i32, i32
  }
  func.func @transform_1(%arg0: i32, %arg1: i32) -> (i32, i32, i32) {
    %c0_i32 = arith.constant 0 : i32
    %c0_i32_0 = arith.constant 0 : i32
    %c0_i32_1 = arith.constant 0 : i32
    %c0_i32_2 = arith.constant 0 : i32
    return %c0_i32, %c0_i32_0, %c0_i32_1 : i32, i32, i32
  }
  func.func @transform_2(%arg0: i32, %arg1: i32) -> (i32, i32) {
    %c0_i32 = arith.constant 0 : i32
    %c0_i32_0 = arith.constant 0 : i32
    %c0_i32_1 = arith.constant 0 : i32
    return %c0_i32, %c0_i32_0 : i32, i32
  }
  func.func @transform_3(%arg0: i32, %arg1: i32) -> (i32, i32) {
    %c0_i32 = arith.constant 0 : i32
    %c0_i32_0 = arith.constant 0 : i32
    %c0_i32_1 = arith.constant 0 : i32
    return %c0_i32, %c0_i32_0 : i32, i32
  }
  func.func @transform_4(%arg0: i32, %arg1: i32) -> (i32, i32, i32) {
    %c0_i32 = arith.constant 0 : i32
    %c0_i32_0 = arith.constant 0 : i32
    return %arg0, %c0_i32, %arg1 : i32, i32, i32
  }
}

</mosaic_0001>

<bundles_post_ra>
// kernel: conv_block.2
= control target key start
LH: loop header
LB: loop body
LE: loop exit
PB: predicated region body
PF: predicated region fallthrough
CT: control target
= control target key end

     0   :  { %s3077_s9 = smov 0   ;;  %s3079_s10 = smov 0   ;;  %s3775_s0 = inlined_call_operand.vmem [shape: f32[2,1,18,18,8], index: 0, kind: input, shape index: {}]   ;;  %s3776_s1 = inlined_call_operand.vmem [shape: f32[9,8,128], index: 1, kind: input, shape index: {}]   ;;  %s3777_s2 = inlined_call_operand.vmem [shape: f32[4,2,128], index: 2, kind: output, shape index: {}]  }
   0x1   :  { %s3081_s11 = smov 0   ;;  %s3083_s12 = smov 0  }
   0x2   :  { %s3085_s13 = smov 0  }
   0x3 LB: > { %s21_s14 = sadd.s32 1, %s3052_s11  ;;  %s24_s15 = sadd.s32 1, %s3056_s12  ;;  %s3060_s13 = sphi %s3085_s13, %s12_s13   ;;  %s3056_s12 = sphi %s3083_s12, %s3821_s12   ;;  %s3052_s11 = sphi %s3081_s11, %s3820_s11   ;;  %s3048_s10 = sphi %s3079_s10, %s3819_s10   ;;  %s3044_s9 = sphi %s3077_s9, %s3818_s9  }
   0x4   : > { %p22_p0 = scmp.ge.s32.totalorder %s21_s14, 2  ;;  %p2332_p1 = scmp.ge.s32.totalorder %s3060_s13, 1 }
   0x5   : > { %p128_p2 = scmp.lt.s32.totalorder %s3060_s13, 5 }
   0x6   : > { %s3823_s14 = smov (%p22_p0, %s21_s14), 0  ;;  %s3825_s15 = smov (!%p22_p0, %s24_s15), %s3056_s12 }
   0x7   : > { %p129_p3 = pnand %p2332_p1, %p128_p2  ;;  %p26_p4 = scmp.ge.s32.totalorder %s3825_s15, 2 }
   0x9   : > { %s3827_s15 = smov (%p26_p4, %s3825_s15), 0  ;;  %132 = sbr.rel (%p129_p3) target bundleno = 384 (0x180), region = 28 }
   0xe   : > { %v2338_v0 = vld [vmem:[%s3776_s1 + $0x8] sm:$0xff]  ;;  %p151_p5 = scmp.lt.s32.totalorder %s3048_s10, 1  ;;  %v183_v1 = vld [vmem:[%s3776_s1] sm:$0xff]  ;;  %v2371_v2 = vld [vmem:[%s3776_s1 + $0x10] sm:$0xff]  ;;  %s2337_s23 = smul.u32 192, %s3044_s9  ;;  %vm202_vm0 = vcmask 64512  }
   0xf   : > { %2979 = vmatprep.subr.mxu1 %v2338_v0  ;;  %2745 = vmatprep.subr.mxu0 %v2338_v0  ;;  %v2406_v9 = vld [vmem:[%s3776_s1 + $0x18] sm:$0xff]  ;;  %v2439_v10 = vld [vmem:[%s3776_s1 + $0x20] sm:$0xff]  ;;  %v3225_v27 = vld [vmem:[%s3776_s1 + $0x28] sm:$0xff]  ;;  %s2334_s20 = sshll.u32 %s3048_s10, 1  ;;  %vm2242_vm1 = vcmask 1040384  }
  0x10   : > { %2980 = vmatpush3.msra.mxu1 %v2338_v0  ;;  %2746 = vmatpush3.msra.mxu0 %v2338_v0  ;;  %s152_s22 = scalar_select %p151_p5, %s3048_s10, 1  ;;  %v3230_v28 = vld [vmem:[%s3776_s1 + $0x30] sm:$0xff]  ;;  %v2540_v55 = vld [vmem:[%s3776_s1 + $0x38] sm:$0xff]  ;;  %v2573_v56 = vld [vmem:[%s3776_s1 + $0x40] sm:$0xff] }
  0x11   : > { %2771 = vmatprep.subr.mxu1 %v183_v1  ;;  %2797 = vmatprep.subr.mxu0 %v2371_v2  ;;  %s157_s21 = sadd.s32 %s3044_s9, %s2334_s20 }
  0x12   : > { %s2981_s24 = smul.u32 432, %s152_s22  ;;  %p158_p6 = scmp.lt.s32.totalorder %s157_s21, 3 }
  0x14   : > { %s155_s27 = scalar_lea.vmem %s3775_s0, %s2981_s24  ;;  %s3829_s21 = smov (!%p158_p6, %s157_s21), 3 }
  0x15   : > { %s3126_s28 = scalar_lea.vmem %s155_s27, %s2337_s23  ;;  %s2335_s10 = sshll.u32 %s3829_s21, 1 }
  0x16   : > { %v184_v3 = vld [vmem:[%s3126_s28 + $0x1] sm:$0xff]  ;;  %v185_v5 = vld [vmem:[%s3126_s28 + $0x9] sm:$0xff]  ;;  %v3140_v7 = vld [vmem:[%s3126_s28 + $0x19] sm:$0xff]  ;;  %s161_s9 = scalar_lea.vmem %s3777_s2, %s2335_s10 }
  0x17   : > { %v3130_v4 = vld [vmem:[%s3126_s28 + $0x61] sm:$0xff]  ;;  %2747 = vmatprep.mubr.msk.f32.mxu0 %vm202_vm0, %v184_v3  ;;  %v3137_v6 = vld [vmem:[%s3126_s28 + $0x69] sm:$0xff]  ;;  %v3143_v8 = vld [vmem:[%s3126_s28 + $0x79] sm:$0xff] }
  0x18   : > { %2759 = vmatprep.mubr.msk.f32.mxu1 %vm202_vm0, %v3130_v4  ;;  %2748 = vmatmul.mubr.msk.f32.vlgmr.msra.gmra.mxu0 %vm202_vm0, %v185_v5  ;;  %v3155_v11 = vld [vmem:[%s3126_s28 + $0x21] sm:$0xff]  ;;  %v3165_v13 = vld [vmem:[%s3126_s28 + $0x31] sm:$0xff]  ;;  %v3179_v15 = vld [vmem:[%s3126_s28 + $0x39] sm:$0xff] }
  0x19   : > { %2760 = vmatmul.mubr.msk.f32.vlgmr.msra.gmra.mxu1 %vm202_vm0, %v3137_v6  ;;  %2798 = vmatpush3.msra.mxu0 %v2371_v2  ;;  %v3158_v12 = vld [vmem:[%s3126_s28 + $0x81] sm:$0xff]  ;;  %v3168_v14 = vld [vmem:[%s3126_s28 + $0x91] sm:$0xff]  ;;  %v3182_v16 = vld [vmem:[%s3126_s28 + $0x99] sm:$0xff] }
  0x1a   : > { %2772 = vmatpush3.msra.mxu1 %v183_v1  ;;  %2750 = vmatprep.mubr.msk.f32.mxu0 %vm202_vm0, %v3140_v7  ;;  %v3185_v17 = vld [vmem:[%s3126_s28 + $0x49] sm:$0xff]  ;;  %v3199_v19 = vld [vmem:[%s3126_s28 + $0x51] sm:$0xff]  ;;  %v167_v21 = vld [vmem:[%s3126_s28] sm:$0xff] }
  0x1b   : > { %2762 = vmatprep.mubr.msk.f32.mxu1 %vm202_vm0, %v3143_v8  ;;  %2823 = vmatprep.subr.mxu1 %v2406_v9  ;;  %v3188_v18 = vld [vmem:[%s3126_s28 + $0xa9] sm:$0xff]  ;;  %v3202_v20 = vld [vmem:[%s3126_s28 + $0xb1] sm:$0xff]  ;;  %v3218_v26 = vld [vmem:[%s3126_s28 + $0x1a] sm:$0xff] }
  0x1c   : > { %2849 = vmatprep.subr.mxu0 %v2439_v10  ;;  %2751 = vmatmul.mubr.msk.f32.gmra.mxu0 %vm202_vm0, %v3155_v11  ;;  %v589_v22 = vld [vmem:[%s3126_s28 + $0x2] sm:$0xff]  ;;  %v590_v24 = vld [vmem:[%s3126_s28 + $0xa] sm:$0xff]  ;;  %v3215_v25 = vld [vmem:[%s3126_s28 + $0x18] sm:$0xff] }
  0x1d   : > { %2763 = vmatmul.mubr.msk.f32.gmra.mxu1 %vm202_vm0, %v3158_v12  ;;  %2753 = vmatprep.mubr.msk.f32.mxu0 %vm202_vm0, %v3165_v13  ;;  %v168_v23 = vld [vmem:[%s3126_s28 + $0x8] sm:$0xff]  ;;  %v170_v29 = vld [vmem:[%s3126_s28 + $0x20] sm:$0xff]  ;;  %v3241_v31 = vld [vmem:[%s3126_s28 + $0x30] sm:$0xff] }
  0x1e   : > { %2765 = vmatprep.mubr.msk.f32.mxu1 %vm202_vm0, %v3168_v14  ;;  %v3234_v30 = vld [vmem:[%s3126_s28 + $0x22] sm:$0xff]  ;;  %v3244_v32 = vld [vmem:[%s3126_s28 + $0x32] sm:$0xff]  ;;  %v3259_v34 = vld [vmem:[%s3126_s28 + $0x3a] sm:$0xff] }
  0x1f   : > { %v3256_v33 = vld [vmem:[%s3126_s28 + $0x38] sm:$0xff]  ;;  %v3262_v35 = vld [vmem:[%s3126_s28 + $0x48] sm:$0xff]  ;;  %v3276_v37 = vld [vmem:[%s3126_s28 + $0x50] sm:$0xff] }
  0x20   : > { %2754 = vmatmul.mubr.msk.f32.gmra.mxu0 %vm202_vm0, %v3179_v15  ;;  %v3265_v36 = vld [vmem:[%s3126_s28 + $0x4a] sm:$0xff]  ;;  %v3279_v38 = vld [vmem:[%s3126_s28 + $0x52] sm:$0xff]  ;;  %v3282_v39 = vld [vmem:[%s3126_s28 + $0x60] sm:$0xff] }
  0x21   : > { %2766 = vmatmul.mubr.msk.f32.gmra.mxu1 %vm202_vm0, %v3182_v16  ;;  %2756 = vmatprep.mubr.msk.f32.mxu0 %vm202_vm0, %v3185_v17  ;;  %v3285_v40 = vld [vmem:[%s3126_s28 + $0x62] sm:$0xff]  ;;  %v3299_v42 = vld [vmem:[%s3126_s28 + $0x6a] sm:$0xff]  ;;  %v3302_v43 = vld [vmem:[%s3126_s28 + $0x78] sm:$0xff] }
  0x22   : > { %2768 = vmatprep.mubr.msk.f32.mxu1 %vm202_vm0, %v3188_v18  ;;  %v3296_v41 = vld [vmem:[%s3126_s28 + $0x68] sm:$0xff]  ;;  %v3305_v44 = vld [vmem:[%s3126_s28 + $0x7a] sm:$0xff]  ;;  %v3322_v47 = vld [vmem:[%s3126_s28 + $0x90] sm:$0xff] }
  0x23   : > { %v3316_v45 = vld [vmem:[%s3126_s28 + $0x80] sm:$0xff]  ;;  %v3325_v48 = vld [vmem:[%s3126_s28 + $0x92] sm:$0xff]  ;;  %v3342_v51 = vld [vmem:[%s3126_s28 + $0xa8] sm:$0xff] }
  0x24   : > { %2757 = vmatmul.mubr.msk.f32.gmra.mxu0 %vm202_vm0, %v3199_v19  ;;  %v3319_v46 = vld [vmem:[%s3126_s28 + $0x82] sm:$0xff]  ;;  %v3336_v49 = vld [vmem:[%s3126_s28 + $0x98] sm:$0xff]  ;;  %v3345_v52 = vld [vmem:[%s3126_s28 + $0xaa] sm:$0xff] }
  0x25   : > { %2769 = vmatmul.mubr.msk.f32.gmra.mxu1 %vm202_vm0, %v3202_v20  ;;  %2799 = vmatprep.mubr.msk.f32.mxu0 %vm202_vm0, %v589_v22  ;;  %v3339_v50 = vld [vmem:[%s3126_s28 + $0x9a] sm:$0xff]  ;;  %v3356_v53 = vld [vmem:[%s3126_s28 + $0xb0] sm:$0xff]  ;;  %v2405_v59 = vld [vmem:[%s3126_s28 + $0xc8] sm:$0xff] }
  0x26   : > { %2773 = vmatprep.mubr.msk.f32.mxu1 %vm202_vm0, %v167_v21  ;;  %v3359_v54 = vld [vmem:[%s3126_s28 + $0xb2] sm:$0xff]  ;;  %v2404_v57 = vld [vmem:[%s3126_s28 + $0xc0] sm:$0xff]  ;;  %v3437_v60 = vld [vmem:[%s3126_s28 + $0xc9] sm:$0xff] }
  0x27   : > { %v3426_v58 = vld [vmem:[%s3126_s28 + $0xc1] sm:$0xff]  ;;  %v2505_v62 = vld [vmem:[%s3126_s28 + $0xd8] sm:$0xff]  ;;  %v2471_v63 = vld [vmem:[%s3126_s28 + $0xca] sm:$0xff] }
  0x28   : > { %2800 = vmatmul.mubr.msk.f32.vlgmr.msra.gmra.mxu0 %vm202_vm0, %v590_v24  ;;  %v2470_v61 = vld [vmem:[%s3126_s28 + $0xc2] sm:$0xff]  ;;  %v2538_v1 = vld [vmem:[%s3126_s28 + $0xd9] sm:$0xff] }
  0x29   : > { %2774 = vmatmul.mubr.msk.f32.vlgmr.msra.gmra.mxu1 %vm202_vm0, %v168_v23  ;;  %2850 = vmatpush3.msra.mxu0 %v2439_v10  ;;  %v2506_v0 = vld [vmem:[%s3126_s28 + $0xe0] sm:$0xff] }
  0x2a   : > { %2824 = vmatpush3.msra.mxu1 %v2406_v9  ;;  %2776 = vmatprep.mubr.msk.f32.mxu1 %vm202_vm0, %v3215_v25  ;;  %v2571_v2 = vld [vmem:[%s3126_s28 + $0xda] sm:$0xff] }
  0x2b   : > { %2802 = vmatprep.mubr.msk.f32.mxu0 %vm202_vm0, %v3218_v26  ;;  %2875 = vmatprep.subr.mxu1 %v3225_v27  ;;  %v2539_v3 = vld [vmem:[%s3126_s28 + $0xe1] sm:$0xff] }
  0x2c   : > { %2901 = vmatprep.subr.mxu0 %v3230_v28  ;;  %2803 = vmatmul.mubr.msk.f32.gmra.mxu0 %vm202_vm0, %v3234_v30 }
  0x2d   : > { %2777 = vmatmul.mubr.msk.f32.gmra.mxu1 %vm202_vm0, %v170_v29  ;;  %2805 = vmatprep.mubr.msk.f32.mxu0 %vm202_vm0, %v3244_v32 }
  0x2e   : > { %2779 = vmatprep.mubr.msk.f32.mxu1 %vm202_vm0, %v3241_v31 }
  0x30   : > { %2806 = vmatmul.mubr.msk.f32.gmra.mxu0 %vm202_vm0, %v3259_v34 }
  0x31   : > { %2780 = vmatmul.mubr.msk.f32.gmra.mxu1 %vm202_vm0, %v3256_v33  ;;  %2808 = vmatprep.mubr.msk.f32.mxu0 %vm202_vm0, %v3265_v36 }
  0x32   : > { %2782 = vmatprep.mubr.msk.f32.mxu1 %vm202_vm0, %v3262_v35 }
  0x34   : > { %2809 = vmatmul.mubr.msk.f32.gmra.mxu0 %vm202_vm0, %v3279_v38 }
  0x35   : > { %2783 = vmatmul.mubr.msk.f32.gmra.mxu1 %vm202_vm0, %v3276_v37  ;;  %2811 = vmatprep.mubr.msk.f32.mxu0 %vm202_vm0, %v3285_v40 }
  0x36   : > { %2785 = vmatprep.mubr.msk.f32.mxu1 %vm202_vm0, %v3282_v39 }
  0x38   : > { %2812 = vmatmul.mubr.msk.f32.gmra.mxu0 %vm202_vm0, %v3299_v42 }
  0x39   : > { %2786 = vmatmul.mubr.msk.f32.gmra.mxu1 %vm202_vm0, %v3296_v41  ;;  %2814 = vmatprep.mubr.msk.f32.mxu0 %vm202_vm0, %v3305_v44 }
  0x3a   : > { %2788 = vmatprep.mubr.msk.f32.mxu1 %vm202_vm0, %v3302_v43 }
  0x3c   : > { %2815 = vmatmul.mubr.msk.f32.gmra.mxu0 %vm202_vm0, %v3319_v46 }
  0x3d   : > { %2789 = vmatmul.mubr.msk.f32.gmra.mxu1 %vm202_vm0, %v3316_v45  ;;  %2817 = vmatprep.mubr.msk.f32.mxu0 %vm202_vm0, %v3325_v48 }
  0x3e   : > { %2791 = vmatprep.mubr.msk.f32.mxu1 %vm202_vm0, %v3322_v47 }
  0x40   : > { %2818 = vmatmul.mubr.msk.f32.gmra.mxu0 %vm202_vm0, %v3339_v50 }
  0x41   : > { %2792 = vmatmul.mubr.msk.f32.gmra.mxu1 %vm202_vm0, %v3336_v49  ;;  %2820 = vmatprep.mubr.msk.f32.mxu0 %vm202_vm0, %v3345_v52 }
  0x42   : > { %2794 = vmatprep.mubr.msk.f32.mxu1 %vm202_vm0, %v3342_v51 }
  0x44   : > { %2821 = vmatmul.mubr.msk.f32.gmra.mxu0 %vm202_vm0, %v3359_v54 }
  0x45   : > { %2795 = vmatmul.mubr.msk.f32.gmra.mxu1 %vm202_vm0, %v3356_v53  ;;  %2851 = vmatprep.mubr.msk.f32.mxu0 %vm202_vm0, %v3140_v7 }
  0x46   : > { %2825 = vmatprep.mubr.msk.f32.mxu1 %vm202_vm0, %v3215_v25 }
  0x48   : > { %2852 = vmatmul.mubr.msk.f32.vlgmr.msra.gmra.mxu0 %vm202_vm0, %v3155_v11 }
  0x49   : > { %2826 = vmatmul.mubr.msk.f32.vlgmr.msra.gmra.mxu1 %vm202_vm0, %v170_v29  ;;  %2902 = vmatpush3.msra.mxu0 %v3230_v28 }
  0x4a   : > { %2876 = vmatpush3.msra.mxu1 %v3225_v27  ;;  %2828 = vmatprep.mubr.msk.f32.mxu1 %vm202_vm0, %v3241_v31 }
  0x4b   : > { %2854 = vmatprep.mubr.msk.f32.mxu0 %vm202_vm0, %v3165_v13  ;;  %2927 = vmatprep.subr.mxu1 %v2540_v55 }
  0x4c   : > { %2953 = vmatprep.subr.mxu0 %v2573_v56  ;;  %2855 = vmatmul.mubr.msk.f32.gmra.mxu0 %vm202_vm0, %v3179_v15 }
  0x4d   : > { %2829 = vmatmul.mubr.msk.f32.gmra.mxu1 %vm202_vm0, %v3256_v33  ;;  %2857 = vmatprep.mubr.msk.f32.mxu0 %vm202_vm0, %v3185_v17 }
  0x4e   : > { %2831 = vmatprep.mubr.msk.f32.mxu1 %vm202_vm0, %v3262_v35 }
  0x50   : > { %2858 = vmatmul.mubr.msk.f32.gmra.mxu0 %vm202_vm0, %v3199_v19 }
  0x51   : > { %2832 = vmatmul.mubr.msk.f32.gmra.mxu1 %vm202_vm0, %v3276_v37  ;;  %2860 = vmatprep.mubr.msk.f32.mxu0 %vm202_vm0, %v3130_v4 }
  0x52   : > { %2834 = vmatprep.mubr.msk.f32.mxu1 %vm202_vm0, %v3282_v39 }
  0x54   : > { %2861 = vmatmul.mubr.msk.f32.gmra.mxu0 %vm202_vm0, %v3137_v6 }
  0x55   : > { %2835 = vmatmul.mubr.msk.f32.gmra.mxu1 %vm202_vm0, %v3296_v41  ;;  %2863 = vmatprep.mubr.msk.f32.mxu0 %vm202_vm0, %v3143_v8 }
  0x56   : > { %2837 = vmatprep.mubr.msk.f32.mxu1 %vm202_vm0, %v3302_v43 }
  0x58   : > { %2864 = vmatmul.mubr.msk.f32.gmra.mxu0 %vm202_vm0, %v3158_v12 }
  0x59   : > { %2838 = vmatmul.mubr.msk.f32.gmra.mxu1 %vm202_vm0, %v3316_v45  ;;  %2866 = vmatprep.mubr.msk.f32.mxu0 %vm202_vm0, %v3168_v14 }
  0x5a   : > { %2840 = vmatprep.mubr.msk.f32.mxu1 %vm202_vm0, %v3322_v47 }
  0x5c   : > { %2867 = vmatmul.mubr.msk.f32.gmra.mxu0 %vm202_vm0, %v3182_v16 }
  0x5d   : > { %2841 = vmatmul.mubr.msk.f32.gmra.mxu1 %vm202_vm0, %v3336_v49  ;;  %2869 = vmatprep.mubr.msk.f32.mxu0 %vm202_vm0, %v3188_v18 }
  0x5e   : > { %2843 = vmatprep.mubr.msk.f32.mxu1 %vm202_vm0, %v3342_v51 }
  0x60   : > { %2870 = vmatmul.mubr.msk.f32.gmra.mxu0 %vm202_vm0, %v3202_v20 }
  0x61   : > { %2844 = vmatmul.mubr.msk.f32.gmra.mxu1 %vm202_vm0, %v3356_v53  ;;  %2872 = vmatprep.mubr.msk.f32.mxu0 %vm202_vm0, %v3426_v58 }
  0x62   : > { %2846 = vmatprep.mubr.msk.f32.mxu1 %vm202_vm0, %v2404_v57 }
  0x64   : > { %2873 = vmatmul.mubr.msk.f32.gmra.mxu0 %vm202_vm0, %v3437_v60 }
  0x65   : > { %2847 = vmatmul.mubr.msk.f32.gmra.mxu1 %vm202_vm0, %v2405_v59  ;;  %2903 = vmatprep.mubr.msk.f32.mxu0 %vm202_vm0, %v3241_v31 }
  0x66   : > { %2877 = vmatprep.mubr.msk.f32.mxu1 %vm202_vm0, %v3218_v26 }
  0x68   : > { %2904 = vmatmul.mubr.msk.f32.vlgmr.msra.gmra.mxu0 %vm202_vm0, %v3256_v33 }
  0x69   : > { %2878 = vmatmul.mubr.msk.f32.vlgmr.msra.gmra.mxu1 %vm202_vm0, %v3234_v30  ;;  %2954 = vmatpush3.msra.mxu0 %v2573_v56 }
  0x6a   : > { %2928 = vmatpush3.msra.mxu1 %v2540_v55  ;;  %2880 = vmatprep.mubr.msk.f32.mxu1 %vm202_vm0, %v3244_v32 }
  0x6b   : > { %2906 = vmatprep.mubr.msk.f32.mxu0 %vm202_vm0, %v3262_v35 }
  0x6c   : > { %2907 = vmatmul.mubr.msk.f32.gmra.mxu0 %vm202_vm0, %v3276_v37 }
  0x6d   : > { %2881 = vmatmul.mubr.msk.f32.gmra.mxu1 %vm202_vm0, %v3259_v34  ;;  %2909 = vmatprep.mubr.msk.f32.mxu0 %vm202_vm0, %v3282_v39 }
  0x6e   : > { %2883 = vmatprep.mubr.msk.f32.mxu1 %vm202_vm0, %v3265_v36 }
  0x70   : > { %2910 = vmatmul.mubr.msk.f32.gmra.mxu0 %vm202_vm0, %v3296_v41 }
  0x71   : > { %2884 = vmatmul.mubr.msk.f32.gmra.mxu1 %vm202_vm0, %v3279_v38  ;;  %2912 = vmatprep.mubr.msk.f32.mxu0 %vm202_vm0, %v3302_v43 }
  0x72   : > { %2886 = vmatprep.mubr.msk.f32.mxu1 %vm202_vm0, %v3285_v40 }
  0x74   : > { %2913 = vmatmul.mubr.msk.f32.gmra.mxu0 %vm202_vm0, %v3316_v45 }
  0x75   : > { %2887 = vmatmul.mubr.msk.f32.gmra.mxu1 %vm202_vm0, %v3299_v42  ;;  %2915 = vmatprep.mubr.msk.f32.mxu0 %vm202_vm0, %v3322_v47 }
  0x76   : > { %2889 = vmatprep.mubr.msk.f32.mxu1 %vm202_vm0, %v3305_v44 }
  0x78   : > { %2916 = vmatmul.mubr.msk.f32.gmra.mxu0 %vm202_vm0, %v3336_v49 }
  0x79   : > { %2890 = vmatmul.mubr.msk.f32.gmra.mxu1 %vm202_vm0, %v3319_v46  ;;  %2918 = vmatprep.mubr.msk.f32.mxu0 %vm202_vm0, %v3342_v51 }
  0x7a   : > { %2892 = vmatprep.mubr.msk.f32.mxu1 %vm202_vm0, %v3325_v48 }
  0x7c   : > { %2919 = vmatmul.mubr.msk.f32.gmra.mxu0 %vm202_vm0, %v3356_v53 }
  0x7d   : > { %2893 = vmatmul.mubr.msk.f32.gmra.mxu1 %vm202_vm0, %v3339_v50  ;;  %2921 = vmatprep.mubr.msk.f32.mxu0 %vm202_vm0, %v2404_v57 }
  0x7e   : > { %2895 = vmatprep.mubr.msk.f32.mxu1 %vm202_vm0, %v3345_v52 }
  0x80   : > { %2922 = vmatmul.mubr.msk.f32.gmra.mxu0 %vm202_vm0, %v2405_v59 }
  0x81   : > { %2896 = vmatmul.mubr.msk.f32.gmra.mxu1 %vm202_vm0, %v3359_v54  ;;  %2924 = vmatprep.mubr.msk.f32.mxu0 %vm202_vm0, %v2505_v62 }
  0x82   : > { %2898 = vmatprep.mubr.msk.f32.mxu1 %vm202_vm0, %v2470_v61 }
  0x84   : > { %2925 = vmatmul.mubr.msk.f32.gmra.mxu0 %vm202_vm0, %v2506_v0 }
  0x85   : > { %2899 = vmatmul.mubr.msk.f32.gmra.mxu1 %vm202_vm0, %v2471_v63  ;;  %2955 = vmatprep.mubr.msk.f32.mxu0 %vm202_vm0, %v3244_v32 }
  0x86   : > { %2929 = vmatprep.mubr.msk.f32.mxu1 %vm202_vm0, %v3165_v13 }
  0x88   : > { %2956 = vmatmul.mubr.msk.f32.vlgmr.msra.gmra.mxu0 %vm202_vm0, %v3259_v34 }
  0x89   : > { %2930 = vmatmul.mubr.msk.f32.vlgmr.msra.gmra.mxu1 %vm202_vm0, %v3179_v15  ;;  %2958 = vmatprep.mubr.msk.f32.mxu0 %vm202_vm0, %v3265_v36 }
  0x8a   : > { %2932 = vmatprep.mubr.msk.f32.mxu1 %vm202_vm0, %v3185_v17 }
  0x8c   : > { %2959 = vmatmul.mubr.msk.f32.gmra.mxu0 %vm202_vm0, %v3279_v38 }
  0x8d   : > { %2933 = vmatmul.mubr.msk.f32.gmra.mxu1 %vm202_vm0, %v3199_v19  ;;  %2961 = vmatprep.mubr.msk.f32.mxu0 %vm202_vm0, %v3285_v40 }
  0x8e   : > { %2935 = vmatprep.mubr.msk.f32.mxu1 %vm202_vm0, %v3130_v4  ;;  %v2572_v4 = vld [vmem:[%s3126_s28 + $0xe2] sm:$0xff] }
  0x90   : > { %2962 = vmatmul.mubr.msk.f32.gmra.mxu0 %vm202_vm0, %v3299_v42 }
  0x91   : > { %2936 = vmatmul.mubr.msk.f32.gmra.mxu1 %vm202_vm0, %v3137_v6  ;;  %2964 = vmatprep.mubr.msk.f32.mxu0 %vm202_vm0, %v3305_v44 }
  0x92   : > { %2938 = vmatprep.mubr.msk.f32.mxu1 %vm202_vm0, %v3143_v8 }
  0x94   : > { %2965 = vmatmul.mubr.msk.f32.gmra.mxu0 %vm202_vm0, %v3319_v46 }
  0x95   : > { %2939 = vmatmul.mubr.msk.f32.gmra.mxu1 %vm202_vm0, %v3158_v12  ;;  %2967 = vmatprep.mubr.msk.f32.mxu0 %vm202_vm0, %v3325_v48 }
  0x96   : > { %2941 = vmatprep.mubr.msk.f32.mxu1 %vm202_vm0, %v3168_v14 }
  0x98   : > { %2968 = vmatmul.mubr.msk.f32.gmra.mxu0 %vm202_vm0, %v3339_v50 }
  0x99   : > { %2942 = vmatmul.mubr.msk.f32.gmra.mxu1 %vm202_vm0, %v3182_v16  ;;  %2970 = vmatprep.mubr.msk.f32.mxu0 %vm202_vm0, %v3345_v52 }
  0x9a   : > { %2944 = vmatprep.mubr.msk.f32.mxu1 %vm202_vm0, %v3188_v18 }
  0x9c   : > { %2971 = vmatmul.mubr.msk.f32.gmra.mxu0 %vm202_vm0, %v3359_v54 }
  0x9d   : > { %2945 = vmatmul.mubr.msk.f32.gmra.mxu1 %vm202_vm0, %v3202_v20  ;;  %2973 = vmatprep.mubr.msk.f32.mxu0 %vm202_vm0, %v2470_v61 }
  0x9e   : > { %2947 = vmatprep.mubr.msk.f32.mxu1 %vm202_vm0, %v3426_v58 }
  0xa0   : > { %2974 = vmatmul.mubr.msk.f32.gmra.mxu0 %vm202_vm0, %v2471_v63 }
  0xa1   : > { %2948 = vmatmul.mubr.msk.f32.gmra.mxu1 %vm202_vm0, %v3437_v60  ;;  %2976 = vmatprep.mubr.msk.f32.mxu0 %vm202_vm0, %v2571_v2 }
  0xa2   : > { %2950 = vmatprep.mubr.msk.f32.mxu1 %vm202_vm0, %v2538_v1 }
  0xa4   : > { %2977 = vmatmul.mubr.msk.f32.gmra.mxu0 %vm202_vm0, %v2572_v4 }
  0xa5   : > { %2951 = vmatmul.mubr.msk.f32.gmra.mxu1 %vm202_vm0, %v2539_v3 }
  0xd8   : > { %v2749_v5 = vpop.f32.mrf.mxu0 }
  0xd9   : > { %v2761_v6 = vpop.f32.mrf.mxu1 }
  0xda   : > { %v317_v7 = vpop.f32.mrf.mxu0 }
  0xdb   : > { %v357_v8 = vpop.f32.mrf.mxu1 }
  0xdc   : > { %v2752_v9 = vpop.f32.mrf.mxu0 }
  0xdd   : > { %v2764_v10 = vpop.f32.mrf.mxu1 }
  0xde   : > { %v327_v11 = vpop.f32.mrf.mxu0 }
  0xdf   : > { %v367_v12 = vpop.f32.mrf.mxu1 }
  0xe0   : > { %v2755_v13 = vpop.f32.mrf.mxu0 }
  0xe1   : > { %v2767_v14 = vpop.f32.mrf.mxu1 }
  0xe2   : > { %v337_v15 = vpop.f32.mrf.mxu0 }
  0xe3   : > { %v377_v16 = vpop.f32.mrf.mxu1 }
  0xe4   : > { %v2758_v17 = vpop.f32.mrf.mxu0 }
  0xe5   : > { %v2770_v18 = vpop.f32.mrf.mxu1 }
  0xe6   : > { %v347_v19 = vpop.f32.mrf.mxu0 }
  0xe7   : > { %v3566_v20 = vpop.f32.mrf.mxu1 }
  0xe8   : > { %v2801_v22 = vpop.f32.mrf.mxu0 }
  0xe9   : > { %v2775_v21 = vpop.f32.mrf.mxu1 }
  0xea   : > { %v516_v23 = vadd.f32 %v2775_v21, %v2749_v5  ;;  %v721_v25 = vpop.f32.mrf.mxu0 }
  0xeb   : > { %v510_v24 = vpop.f32.mrf.mxu1 }
  0xec   : > { %v3568_v26 = vadd.f32 %v2801_v22, %v516_v23  ;;  %v511_v27 = vadd.f32 %v510_v24, %v317_v7  ;;  %v2804_v29 = vpop.f32.mrf.mxu0 }
  0xed   : > { %v2778_v28 = vpop.f32.mrf.mxu1 }
  0xee   : > { %v3570_v30 = vadd.f32 %v721_v25, %v511_v27  ;;  %v526_v31 = vadd.f32 %v2778_v28, %v2752_v9  ;;  %v731_v33 = vpop.f32.mrf.mxu0 }
  0xef   : > { %v520_v32 = vpop.f32.mrf.mxu1 }
  0xf0   : > { %v3572_v34 = vadd.f32 %v2804_v29, %v526_v31  ;;  %v521_v35 = vadd.f32 %v520_v32, %v327_v11  ;;  %v2807_v37 = vpop.f32.mrf.mxu0 }
  0xf1   : > { %v2781_v36 = vpop.f32.mrf.mxu1 }
  0xf2   : > { %v3574_v38 = vadd.f32 %v731_v33, %v521_v35  ;;  %v536_v39 = vadd.f32 %v2781_v36, %v2755_v13  ;;  %v741_v41 = vpop.f32.mrf.mxu0 }
  0xf3   : > { %v530_v40 = vpop.f32.mrf.mxu1 }
  0xf4   : > { %v3576_v42 = vadd.f32 %v2807_v37, %v536_v39  ;;  %v531_v43 = vadd.f32 %v530_v40, %v337_v15  ;;  %v2810_v45 = vpop.f32.mrf.mxu0 }
  0xf5   : > { %v2784_v44 = vpop.f32.mrf.mxu1 }
  0xf6   : > { %v3578_v46 = vadd.f32 %v741_v41, %v531_v43  ;;  %v546_v47 = vadd.f32 %v2784_v44, %v2758_v17  ;;  %v751_v49 = vpop.f32.mrf.mxu0 }
  0xf7   : > { %v540_v48 = vpop.f32.mrf.mxu1 }
  0xf8   : > { %v3580_v50 = vadd.f32 %v2810_v45, %v546_v47  ;;  %v541_v51 = vadd.f32 %v540_v48, %v347_v19  ;;  %v2813_v53 = vpop.f32.mrf.mxu0 }
  0xf9   : > { %v2787_v52 = vpop.f32.mrf.mxu1 }
  0xfa   : > { %v3582_v54 = vadd.f32 %v751_v49, %v541_v51  ;;  %v556_v55 = vadd.f32 %v2787_v52, %v2761_v6  ;;  %v761_v57 = vpop.f32.mrf.mxu0 }
  0xfb   : > { %v550_v56 = vpop.f32.mrf.mxu1 }
  0xfc   : > { %v3584_v58 = vadd.f32 %v2813_v53, %v556_v55  ;;  %v551_v59 = vadd.f32 %v550_v56, %v357_v8  ;;  %v2816_v61 = vpop.f32.mrf.mxu0 }
  0xfd   : > { %v2790_v60 = vpop.f32.mrf.mxu1 }
  0xfe   : > { %v3586_v62 = vadd.f32 %v761_v57, %v551_v59  ;;  %v566_v63 = vadd.f32 %v2790_v60, %v2764_v10  ;;  %v771_v1 = vpop.f32.mrf.mxu0 }
  0xff   : > { %v560_v0 = vpop.f32.mrf.mxu1 }
 0x100   : > { %v3588_v2 = vadd.f32 %v2816_v61, %v566_v63  ;;  %v561_v3 = vadd.f32 %v560_v0, %v367_v12  ;;  %v2819_v5 = vpop.f32.mrf.mxu0 }
 0x101   : > { %v2793_v4 = vpop.f32.mrf.mxu1 }
 0x102   : > { %v3590_v7 = vadd.f32 %v771_v1, %v561_v3  ;;  %v576_v6 = vadd.f32 %v2793_v4, %v2767_v14  ;;  %v781_v11 = vpop.f32.mrf.mxu0 }
 0x103   : > { %v570_v9 = vpop.f32.mrf.mxu1 }
 0x104   : > { %v3592_v13 = vadd.f32 %v2819_v5, %v576_v6  ;;  %v571_v8 = vadd.f32 %v570_v9, %v377_v16  ;;  %v2822_v17 = vpop.f32.mrf.mxu0 }
 0x105   : > { %v2796_v15 = vpop.f32.mrf.mxu1 }
 0x106   : > { %v3594_v19 = vadd.f32 %v781_v11, %v571_v8  ;;  %v586_v10 = vadd.f32 %v2796_v15, %v2770_v18  ;;  %v791_v22 = vpop.f32.mrf.mxu0 }
 0x107   : > { %v580_v21 = vpop.f32.mrf.mxu1 }
 0x108   : > { %v3596_v23 = vadd.f32 %v2822_v17, %v586_v10  ;;  %v581_v12 = vadd.f32 %v580_v21, %v3566_v20  ;;  %v2853_v25 = vpop.f32.mrf.mxu0 }
 0x109   : > { %v2827_v24 = vpop.f32.mrf.mxu1 }
 0x10a   : > { %3778 = vst [vmem:[#allocation2_spill] sm:$0xff] %v3596_v23  ;;  %v3599_v27 = vadd.f32 %v791_v22, %v581_v12  ;;  %v1178_v28 = vpop.f32.mrf.mxu0 }
 0x10b   : > { %v951_v14 = vpop.f32.mrf.mxu1 }
 0x10c   : > { %3779 = vst [vmem:[#allocation3_spill] sm:$0xff] %v3599_v27  ;;  %v3601_v31 = vpop.f32.mrf.mxu0 }
 0x10d   : > { %v2830_v29 = vpop.f32.mrf.mxu1 }
 0x10e   : > { %v3603_v32 = vpop.f32.mrf.mxu0 }
 0x10f   : > { %v961_v16 = vpop.f32.mrf.mxu1 }
 0x110   : > { %v3605_v18 = vpop.f32.mrf.mxu0 }
 0x111   : > { %v2833_v33 = vpop.f32.mrf.mxu1 }
 0x112   : > { %v3607_v36 = vpop.f32.mrf.mxu0 }
 0x113   : > { %v971_v35 = vpop.f32.mrf.mxu1 }
 0x114   : > { %v3611_v20 = vpop.f32.mrf.mxu0 }
 0x115   : > { %v3609_v37 = vpop.f32.mrf.mxu1 }
 0x116   : > { %v3615_v40 = vpop.f32.mrf.mxu0 }
 0x117   : > { %v3613_v39 = vpop.f32.mrf.mxu1 }
 0x118   : > { %v3619_v43 = vpop.f32.mrf.mxu0 }
 0x119   : > { %v3617_v41 = vpop.f32.mrf.mxu1 }
 0x11a   : > { %v3623_v45 = vpop.f32.mrf.mxu0 }
 0x11b   : > { %v3621_v44 = vpop.f32.mrf.mxu1 }
 0x11c   : > { %v3627_v48 = vpop.f32.mrf.mxu0 }
 0x11d   : > { %v3625_v47 = vpop.f32.mrf.mxu1 }
 0x11e   : > { %v3631_v51 = vpop.f32.mrf.mxu0 }
 0x11f   : > { %v3629_v49 = vpop.f32.mrf.mxu1 }
 0x120   : > { %v3635_v53 = vpop.f32.mrf.mxu0 }
 0x121   : > { %v3633_v52 = vpop.f32.mrf.mxu1  ;;  %3780 = vst [vmem:[#allocation4_spill] sm:$0xff] %v3635_v53 }
 0x122   : > { %v3639_v56 = vpop.f32.mrf.mxu0 }
 0x123   : > { %v3637_v55 = vpop.f32.mrf.mxu1  ;;  %3782 = vst [vmem:[#allocation6_spill] sm:$0xff] %v3639_v56  ;;  %v1031_v56 = vadd.f32 %v2827_v24, %v3568_v26  ;;  %v1032_v26 = vadd.f32 %v961_v16, %v3574_v38 }
 0x124   : > { %3781 = vst [vmem:[#allocation5_spill] sm:$0xff] %v3637_v55  ;;  %v3643_v59 = vpop.f32.mrf.mxu0 }
 0x125   : > { %v3641_v57 = vpop.f32.mrf.mxu1  ;;  %3784 = vst [vmem:[#allocation8_spill] sm:$0xff] %v3643_v59 }
 0x126   : > { %3783 = vst [vmem:[#allocation7_spill] sm:$0xff] %v3641_v57  ;;  %v3647_v61 = vpop.f32.mrf.mxu0 }
 0x127   : > { %v3645_v60 = vpop.f32.mrf.mxu1  ;;  %3786 = vst [vmem:[#allocation10_spill] sm:$0xff] %v3647_v61 }
 0x128   : > { %3785 = vst [vmem:[#allocation9_spill] sm:$0xff] %v3645_v60  ;;  %v2905_v0 = vpop.f32.mrf.mxu0 }
 0x129   : > { %v2879_v63 = vpop.f32.mrf.mxu1 }
 0x12a   : > { %v1635_v3 = vpop.f32.mrf.mxu0 }
 0x12b   : > { %v1405_v1 = vpop.f32.mrf.mxu1 }
 0x12c   : > { %v2908_v5 = vpop.f32.mrf.mxu0 }
 0x12d   : > { %v2882_v4 = vpop.f32.mrf.mxu1 }
 0x12e   : > { %v1645_v9 = vpop.f32.mrf.mxu0 }
 0x12f   : > { %v1415_v6 = vpop.f32.mrf.mxu1 }
 0x130   : > { %v3649_v8 = vpop.f32.mrf.mxu0 }
 0x131   : > { %v2885_v11 = vpop.f32.mrf.mxu1 }
 0x132   : > { %v3651_v17 = vpop.f32.mrf.mxu0 }
 0x133   : > { %v1425_v15 = vpop.f32.mrf.mxu1 }
 0x134   : > { %v3655_v21 = vpop.f32.mrf.mxu0 }
 0x135   : > { %v3653_v10 = vpop.f32.mrf.mxu1  ;;  %3787 = vst [vmem:[#allocation11_spill] sm:$0xff] %v3655_v21 }
 0x136   : > { %v3659_v12 = vpop.f32.mrf.mxu0 }
 0x137   : > { %v3657_v22 = vpop.f32.mrf.mxu1  ;;  %3788 = vst [vmem:[#allocation12_spill] sm:$0xff] %v3659_v12  ;;  %v1030_v12 = vadd.f32 %v951_v14, %v3570_v30 }
 0x138   : > { %v3663_v59 = vpop.f32.mrf.mxu0 }
 0x139   : > { %v3661_v61 = vpop.f32.mrf.mxu1  ;;  %3790 = vst [vmem:[#allocation14_spill] sm:$0xff] %v3663_v59  ;;  %v1258_v59 = vadd.f32 %v2853_v25, %v1031_v56  ;;  %v1034_v25 = vadd.f32 %v971_v35, %v3578_v46 }
 0x13a   : > { %3789 = vst [vmem:[#allocation13_spill] sm:$0xff] %v3661_v61  ;;  %v3667_v27 = vpop.f32.mrf.mxu0 }
 0x13b   : > { %v3665_v60 = vpop.f32.mrf.mxu1  ;;  %3792 = vst [vmem:[#allocation16_spill] sm:$0xff] %v3667_v27  ;;  %v1485_v24 = vadd.f32 %v2879_v63, %v1258_v59 }
 0x13c   : > { %3791 = vst [vmem:[#allocation15_spill] sm:$0xff] %v3665_v60  ;;  %v3671_v23 = vpop.f32.mrf.mxu0  ;;  %v1033_v60 = vadd.f32 %v2830_v29, %v3572_v34 }
 0x13d   : > { %v3669_v57 = vpop.f32.mrf.mxu1  ;;  %3794 = vst [vmem:[#allocation18_spill] sm:$0xff] %v3671_v23  ;;  %v1257_v23 = vadd.f32 %v1178_v28, %v1030_v12  ;;  %v1259_v28 = vadd.f32 %v3603_v32, %v1032_v26  ;;  %v1715_v56 = vadd.f32 %v2905_v0, %v1485_v24 }
 0x13e   : > { %3793 = vst [vmem:[#allocation17_spill] sm:$0xff] %v3669_v57  ;;  %v3676_v21 = vpop.f32.mrf.mxu0  ;;  %v1260_v14 = vadd.f32 %v3601_v31, %v1033_v60  ;;  %v1261_v60 = vadd.f32 %v3607_v36, %v1034_v25  ;;  %v1038_v36 = vadd.f32 %v3621_v44, %v3586_v62 }
 0x13f   : > { %v3674_v53 = vpop.f32.mrf.mxu1  ;;  %3796 = vst [vmem:[#allocation20_spill] sm:$0xff] %v3676_v21  ;;  %v1486_v46 = vadd.f32 %v1415_v6, %v1259_v28 }
 0x140   : > { %3795 = vst [vmem:[#allocation19_spill] sm:$0xff] %v3674_v53  ;;  %v3681_v61 = vpop.f32.mrf.mxu0  ;;  %v1035_v53 = vadd.f32 %v2833_v33, %v3576_v42  ;;  %v1487_v38 = vadd.f32 %v2882_v4, %v1260_v14  ;;  %v1037_v42 = vadd.f32 %v3609_v37, %v3580_v50  ;;  %v1039_v50 = vadd.f32 %v3617_v41, %v3584_v58 }
 0x141   : > { %v3679_v55 = vpop.f32.mrf.mxu1  ;;  %3797 = vst [vmem:[#allocation21_spill] sm:$0xff] %v3681_v61  ;;  %v1484_v61 = vadd.f32 %v1405_v1, %v1257_v23  ;;  %v1036_v23 = vadd.f32 %v3613_v39, %v3582_v54  ;;  %v1488_v37 = vadd.f32 %v1425_v15, %v1261_v60  ;;  %v1716_v39 = vadd.f32 %v1645_v9, %v1486_v46  ;;  %v3800_v46 = vld [vmem:[#allocation12_spill] sm:$0xff] }
 0x142   : > { %v3686_v57 = vpop.f32.mrf.mxu0  ;;  %v1262_v16 = vadd.f32 %v3605_v18, %v1035_v53  ;;  %v1717_v0 = vadd.f32 %v2908_v5, %v1487_v38  ;;  %v1264_v18 = vadd.f32 %v3611_v20, %v1037_v42  ;;  %v1041_v5 = vadd.f32 %v3625_v47, %v3588_v2 }
 0x143   : > { %v3684_v27 = vpop.f32.mrf.mxu1  ;;  %v1714_v31 = vadd.f32 %v1635_v3, %v1484_v61  ;;  %v1263_v54 = vadd.f32 %v3615_v40, %v1036_v23  ;;  %v1040_v20 = vadd.f32 %v3629_v49, %v3590_v7  ;;  %v1266_v9 = vadd.f32 %v3619_v43, %v1039_v50  ;;  %v3799_v23 = vld [vmem:[#allocation11_spill] sm:$0xff] }
 0x144   : > { %v3692_v30 = vpop.f32.mrf.mxu0  ;;  %v1489_v63 = vadd.f32 %v2885_v11, %v1262_v16  ;;  %v1718_v14 = vadd.f32 %v3651_v17, %v1488_v37  ;;  %v1491_v62 = vadd.f32 %v3653_v10, %v1264_v18  ;;  %v1265_v28 = vadd.f32 %v3623_v45, %v1038_v36  ;;  %v3798_v10 = vld [vmem:[#allocation5_spill] sm:$0xff]  ;;  %v3805_v36 = vld [vmem:[#allocation6_spill] sm:$0xff] }
 0x145   : > { %v3690_v21 = vpop.f32.mrf.mxu1  ;;  %v1490_v44 = vadd.f32 %v3657_v22, %v1263_v54  ;;  %v1267_v38 = vadd.f32 %v3631_v51, %v1040_v20  ;;  %v1043_v43 = vadd.f32 %v3633_v52, %v3592_v13  ;;  %v1042_v22 = vadd.f32 %v3798_v10, %v3594_v19  ;;  %v3801_v45 = vld [vmem:[#allocation13_spill] sm:$0xff]  ;;  %v3806_v20 = vld [vmem:[#allocation14_spill] sm:$0xff] }
 0x146   : > { %v3698_v29 = vpop.f32.mrf.mxu0  ;;  %v1719_v6 = vadd.f32 %v3649_v8, %v1489_v63  ;;  %v1493_v60 = vadd.f32 %v3801_v45, %v1266_v9  ;;  %v3804_v18 = vld [vmem:[#allocation17_spill] sm:$0xff] }
 0x147   : > { %v3696_v34 = vpop.f32.mrf.mxu1 }
 0x148   : > { %v2957_v59 = vpop.f32.mrf.mxu0 }
 0x149   : > { %v2931_v33 = vpop.f32.mrf.mxu1 }
 0x14a   : > { %v1942_v35 = vadd.f32 %v2931_v33, %v1715_v56  ;;  %v2089_v32 = vpop.f32.mrf.mxu0  ;;  %v1268_v56 = vadd.f32 %v3627_v48, %v1041_v5  ;;  %v1269_v5 = vadd.f32 %v3805_v36, %v1042_v22 }
 0x14b   : > { %v1862_v1 = vpop.f32.mrf.mxu1 }
 0x14c   : > { %v2169_v4 = vadd.f32 %v2957_v59, %v1942_v35  ;;  %v1941_v12 = vadd.f32 %v1862_v1, %v1714_v31  ;;  %v2960_v26 = vpop.f32.mrf.mxu0  ;;  %v1721_v31 = vadd.f32 %v3799_v23, %v1491_v62  ;;  %v1720_v35 = vadd.f32 %v3800_v46, %v1490_v44  ;;  %v3808_v44 = vld [vmem:[#allocation2_spill] sm:$0xff] }
 0x14d   : > { %v2934_v53 = vpop.f32.mrf.mxu1  ;;  %v1495_v50 = vadd.f32 %v3804_v18, %v1268_v56 }
 0x14e   : > { %v2168_v61 = vadd.f32 %v2089_v32, %v1941_v12  ;;  %v1944_v3 = vadd.f32 %v2934_v53, %v1717_v0  ;;  %v2099_v41 = vpop.f32.mrf.mxu0  ;;  %v2206_v11 = vmul.f32 %v2169_v4, %v2169_v4  ;;  %v3802_v0 = vld [vmem:[#allocation4_spill] sm:$0xff]  ;;  %v3803_v12 = vld [vmem:[#allocation15_spill] sm:$0xff] }
 0x14f   : > { %v1872_v58 = vpop.f32.mrf.mxu1  ;;  %v1492_v19 = vadd.f32 %v3803_v12, %v1265_v28 }
 0x150   : > { %v2184_v15 = vadd.f32 %v2169_v4, %v2168_v61  ;;  %v2205_v24 = vmul.f32 %v2168_v61, %v2168_v61  ;;  %v1943_v40 = vadd.f32 %v1872_v58, %v1716_v39  ;;  %v2963_v47 = vpop.f32.mrf.mxu0  ;;  %v2171_v7 = vadd.f32 %v2960_v26, %v1944_v3  ;;  %v3807_v58 = vld [vmem:[#allocation19_spill] sm:$0xff] }
 0x151   : > { %v2937_v2 = vpop.f32.mrf.mxu1  ;;  %v1270_v4 = vadd.f32 %v3802_v0, %v1043_v43 }
 0x152   : > { %v2221_v25 = vadd.f32 %v2206_v11, %v2205_v24  ;;  %v2170_v49 = vadd.f32 %v2099_v41, %v1943_v40  ;;  %v1946_v8 = vadd.f32 %v2937_v2, %v1719_v6  ;;  %v2109_v16 = vpop.f32.mrf.mxu0  ;;  %v2208_v1 = vmul.f32 %v2171_v7, %v2171_v7  ;;  %v3809_v2 = vld [vmem:[#allocation7_spill] sm:$0xff] }
 0x153   : > { %v1882_v17 = vpop.f32.mrf.mxu1  ;;  %v1723_v6 = vadd.f32 %v3806_v20, %v1493_v60  ;;  %v1494_v41 = vadd.f32 %v3807_v58, %v1267_v38  ;;  %v1497_v23 = vadd.f32 %v3679_v55, %v1270_v4  ;;  %v3817_v55 = vld [vmem:[#allocation21_spill] sm:$0xff] }
 0x154   : > { %v2185_v42 = vadd.f32 %v2184_v15, %v2170_v49  ;;  %v2207_v33 = vmul.f32 %v2170_v49, %v2170_v49  ;;  %v1945_v59 = vadd.f32 %v1882_v17, %v1718_v14  ;;  %v2173_v48 = vadd.f32 %v2963_v47, %v1946_v8  ;;  %v2966_v51 = vpop.f32.mrf.mxu0  ;;  %v3812_v8 = vld [vmem:[#allocation16_spill] sm:$0xff] }
 0x155   : > { %v2940_v63 = vpop.f32.mrf.mxu1  ;;  %v1045_v47 = vadd.f32 %v3809_v2, %v3808_v44  ;;  %v1722_v28 = vadd.f32 %v3812_v8, %v1492_v19  ;;  %v3816_v19 = vld [vmem:[#allocation10_spill] sm:$0xff]  ;;  %v1727_v4 = vadd.f32 %v3817_v55, %v1497_v23 }
 0x156   : > { %v2222_v32 = vadd.f32 %v2221_v25, %v2207_v33  ;;  %v2172_v13 = vadd.f32 %v2109_v16, %v1945_v59  ;;  %v2186_v52 = vadd.f32 %v2185_v42, %v2171_v7  ;;  %v1948_v37 = vadd.f32 %v2940_v63, %v1721_v31  ;;  %v2119_v26 = vpop.f32.mrf.mxu0  ;;  %v3810_v25 = vld [vmem:[#allocation3_spill] sm:$0xff]  ;;  %v3811_v7 = vld [vmem:[#allocation9_spill] sm:$0xff]  ;;  %v3813_v16 = vld [vmem:[#allocation18_spill] sm:$0xff] }
 0x157   : > { %v1892_v53 = vpop.f32.mrf.mxu1  ;;  %v2210_v11 = vmul.f32 %v2173_v48, %v2173_v48  ;;  %v1044_v49 = vadd.f32 %v3811_v7, %v3810_v25  ;;  %v1725_v38 = vadd.f32 %v3813_v16, %v1495_v50  ;;  %v3814_v33 = vld [vmem:[#allocation20_spill] sm:$0xff]  ;;  %v1496_v31 = vadd.f32 %v3684_v27, %v1269_v5 }
 0x158   : > { %v2187_v54 = vadd.f32 %v2186_v52, %v2172_v13  ;;  %v2209_v39 = vmul.f32 %v2172_v13, %v2172_v13  ;;  %v2223_v61 = vadd.f32 %v2222_v32, %v2208_v1  ;;  %v1947_v3 = vadd.f32 %v1892_v53, %v1720_v35  ;;  %v2969_v24 = vpop.f32.mrf.mxu0  ;;  %v3815_v1 = vld [vmem:[#allocation8_spill] sm:$0xff] }
 0x159   : > { %v2943_v15 = vpop.f32.mrf.mxu1  ;;  %v2175_v9 = vadd.f32 %v2966_v51, %v1948_v37  ;;  %v1724_v59 = vadd.f32 %v3814_v33, %v1494_v41  ;;  %v1272_v32 = vadd.f32 %v3815_v1, %v1045_v47  ;;  %v1271_v18 = vadd.f32 %v3816_v19, %v1044_v49 }
 0x15a   : > { %v2224_v40 = vadd.f32 %v2223_v61, %v2209_v39  ;;  %v2174_v14 = vadd.f32 %v2119_v26, %v1947_v3  ;;  %v2188_v62 = vadd.f32 %v2187_v54, %v2173_v48  ;;  %v1950_v56 = vadd.f32 %v2943_v15, %v1723_v6  ;;  %v2129_v17 = vpop.f32.mrf.mxu0 }
 0x15b   : > { %v1902_v43 = vpop.f32.mrf.mxu1  ;;  %v2212_v60 = vmul.f32 %v2175_v9, %v2175_v9  ;;  %v1499_v27 = vadd.f32 %v3690_v21, %v1272_v32  ;;  %v1726_v61 = vadd.f32 %v3686_v57, %v1496_v31  ;;  %v1498_v3 = vadd.f32 %v3696_v34, %v1271_v18 }
 0x15c   : > { %v2189_v10 = vadd.f32 %v2188_v62, %v2174_v14  ;;  %v2211_v22 = vmul.f32 %v2174_v14, %v2174_v14  ;;  %v2225_v42 = vadd.f32 %v2224_v40, %v2210_v11  ;;  %v1949_v46 = vadd.f32 %v1902_v43, %v1722_v28  ;;  %v2972_v45 = vpop.f32.mrf.mxu0 }
 0x15d   : > { %v2946_v35 = vpop.f32.mrf.mxu1  ;;  %v2177_v13 = vadd.f32 %v2969_v24, %v1950_v56  ;;  %v1729_v21 = vadd.f32 %v3692_v30, %v1499_v27  ;;  %v1728_v57 = vadd.f32 %v3698_v29, %v1498_v3 }
 0x15e   : > { %v2226_v48 = vadd.f32 %v2225_v42, %v2211_v22  ;;  %v2190_v63 = vadd.f32 %v2189_v10, %v2175_v9  ;;  %v1952_v51 = vadd.f32 %v2946_v35, %v1725_v38  ;;  %v2176_v52 = vadd.f32 %v2129_v17, %v1949_v46  ;;  %v2139_v12 = vpop.f32.mrf.mxu0 }
 0x15f   : > { %v1912_v0 = vpop.f32.mrf.mxu1  ;;  %v2214_v20 = vmul.f32 %v2177_v13, %v2177_v13 }
 0x160   : > { %v2227_v50 = vadd.f32 %v2226_v48, %v2212_v60  ;;  %v1951_v37 = vadd.f32 %v1912_v0, %v1724_v59  ;;  %v2191_v53 = vadd.f32 %v2190_v63, %v2176_v52  ;;  %v2213_v26 = vmul.f32 %v2176_v52, %v2176_v52  ;;  %v2975_v39 = vpop.f32.mrf.mxu0 }
 0x161   : > { %v2949_v54 = vpop.f32.mrf.mxu1  ;;  %v2179_v36 = vadd.f32 %v2972_v45, %v1952_v51 }
 0x162   : > { %v2178_v5 = vadd.f32 %v2139_v12, %v1951_v37  ;;  %v2228_v6 = vadd.f32 %v2227_v50, %v2213_v26  ;;  %v2192_v58 = vadd.f32 %v2191_v53, %v2177_v13  ;;  %v1954_v41 = vadd.f32 %v2949_v54, %v1727_v4  ;;  %v2149_v15 = vpop.f32.mrf.mxu0 }
 0x163   : > { %v1922_v11 = vpop.f32.mrf.mxu1  ;;  %v2216_v2 = vmul.f32 %v2179_v36, %v2179_v36 }
 0x164   : > { %v2215_v24 = vmul.f32 %v2178_v5, %v2178_v5  ;;  %v1953_v40 = vadd.f32 %v1922_v11, %v1726_v61  ;;  %v2193_v9 = vadd.f32 %v2192_v58, %v2178_v5  ;;  %v2229_v14 = vadd.f32 %v2228_v6, %v2214_v20  ;;  %v2978_v44 = vpop.f32.mrf.mxu0 }
 0x165   : > { %v2952_v62 = vpop.f32.mrf.mxu1  ;;  %v2181_v25 = vadd.f32 %v2975_v39, %v1954_v41 }
 0x166   : > { %v2180_v34 = vadd.f32 %v2149_v15, %v1953_v40  ;;  %v2230_v47 = vadd.f32 %v2229_v14, %v2215_v24  ;;  %v2194_v7 = vadd.f32 %v2193_v9, %v2179_v36  ;;  %v1956_v49 = vadd.f32 %v2952_v62, %v1729_v21  ;;  %v2159_v30 = vpop.f32.mrf.mxu0 }
 0x167   : > { %v1932_v8 = vpop.f32.mrf.mxu1  ;;  %v2218_v38 = vmul.f32 %v2181_v25, %v2181_v25 }
 0x168   : > { %v2217_v28 = vmul.f32 %v2180_v34, %v2180_v34  ;;  %v1955_v56 = vadd.f32 %v1932_v8, %v1728_v57  ;;  %v2195_v43 = vadd.f32 %v2194_v7, %v2180_v34  ;;  %v2231_v17 = vadd.f32 %v2230_v47, %v2216_v2 }
 0x169   : > { %v2183_v22 = vadd.f32 %v2978_v44, %v1956_v49 }
 0x16a   : > { %v2182_v16 = vadd.f32 %v2159_v30, %v1955_v56  ;;  %v2232_v10 = vadd.f32 %v2231_v17, %v2217_v28  ;;  %v2196_v42 = vadd.f32 %v2195_v43, %v2181_v25 }
 0x16b   : > { %v2220_v23 = vmul.f32 %v2183_v22, %v2183_v22 }
 0x16c   : > { %v2219_v29 = vmul.f32 %v2182_v16, %v2182_v16  ;;  %v2197_v33 = vadd.f32 %v2196_v42, %v2182_v16  ;;  %v2233_v59 = vadd.f32 %v2232_v10, %v2218_v38 }
 0x16e   : > { %v2198_v31 = vadd.f32 %v2197_v33, %v2183_v22  ;;  %v2234_v46 = vadd.f32 %v2233_v59, %v2219_v29 }
 0x170   : > { %v2199_v35 = vrot.slane %v2198_v31, 4  ;;  %v2235_v45 = vadd.f32 %v2234_v46, %v2220_v23 }
 0x172   : > { %v2200_v60 = vadd.f32 %v2199_v35, %v2198_v31  ;;  %v2236_v48 = vrot.slane %v2235_v45, 4 }
 0x174   : > { %v2201_v63 = vrot.slane %v2200_v60, 2  ;;  %v2237_v51 = vadd.f32 %v2236_v48, %v2235_v45 }
 0x176   : > { %v2202_v1 = vadd.f32 %v2201_v63, %v2200_v60  ;;  %v2238_v32 = vrot.slane %v2237_v51, 2 }
 0x178   : > { %v2203_v13 = vrot.slane %v2202_v1, 1  ;;  %v2239_v52 = vadd.f32 %v2238_v32, %v2237_v51 }
 0x17a   : > { %v2240_v0 = vrot.slane %v2239_v52, 1  ;;  %v2204_v12 = vadd.f32 %v2203_v13, %v2202_v1 }
 0x17c   : > { %v2241_v19 = vadd.f32 %v2240_v0, %v2239_v52 }
 0x17e   : > { %v2243_v18 = vsel %vm2242_vm1, %v2204_v12, %v2241_v19 }
 0x17f   : > { %2244 = vst [vmem:[%s161_s9] sm:$0x3] %v2243_v18 }
 0x180 PF: > { %s12_s13 = sadd.s32 1, %s3060_s13   ;;  %s3818_s9 = smov %s3052_s11 }
 0x181   : > { %p9_p7 = scmp.ge.s32.totalorder %s12_s13, 6   ;;  %s3819_s10 = smov %s3056_s12 }
 0x182   : > { %s3820_s11 = smov %s3823_s14  ;;  %s3821_s12 = smov %s3827_s15 }
 0x183   :  { %11 = sbr.rel (!%p9_p7) target bundleno = 3 (0x3), region = 69 }

// kernel: conv_block.3
= control target key start
LH: loop header
LB: loop body
LE: loop exit
PB: predicated region body
PF: predicated region fallthrough
CT: control target
= control target key end

     0   :  { %s3309_s15 = smov 0   ;;  %s3311_s16 = smov 0   ;;  %s4060_s0 = inlined_call_operand.vmem [shape: f32[2,1,18,18,8], index: 0, kind: input, shape index: {}]   ;;  %s4061_s1 = inlined_call_operand.vmem [shape: f32[9,8,128], index: 1, kind: input, shape index: {}]   ;;  %s4062_s2 = inlined_call_operand.vmem [shape: f32[1,128], index: 2, kind: input, shape index: {}]   ;;  %s4063_s3 = inlined_call_operand.vmem [shape: f32[1,128], index: 3, kind: input, shape index: {}]   ;;  %s4064_s4 = inlined_call_operand.vmem [shape: f32[2,128,256], index: 4, kind: output, shape index: {}]  }
   0x1   :  { %s3313_s17 = smov 0   ;;  %s3315_s18 = smov 0  }
   0x2   :  { %s3317_s19 = smov 0   ;;  %s3319_s20 = smov 0  }
   0x3   :  { %s3321_s21 = smov 0  }
   0x4 LB: > { %s23_s22 = sadd.s32 1, %s3274_s19  ;;  %s26_s23 = sadd.s32 1, %s3278_s20  ;;  %s3282_s21 = sphi %s3321_s21, %s14_s21   ;;  %s3278_s20 = sphi %s3319_s20, %s4071_s20   ;;  %s3274_s19 = sphi %s3317_s19, %s4070_s19   ;;  %s3270_s18 = sphi %s3315_s18, %s4069_s18   ;;  %s3266_s17 = sphi %s3313_s17, %s4068_s17   ;;  %s3262_s16 = sphi %s3311_s16, %s4067_s16   ;;  %s3258_s15 = sphi %s3309_s15, %s4066_s15  }
   0x5   : > { %p24_p0 = scmp.ge.s32.totalorder %s23_s22, 2  ;;  %s2514_s24 = sadd.s32 4294967295, %s3282_s21  }
   0x6   : > { %p134_p1 = scmp.ne.s32.totalorder %s3262_s16, %s3258_s15  ;;  %p135_p2 = scmp.eq.s32.totalorder %s2514_s24, 3 }
   0x7   : > { %s4073_s22 = smov (%p24_p0, %s23_s22), 0  ;;  %s4075_s23 = smov (!%p24_p0, %s26_s23), %s3278_s20 }
   0x8   : > { %s120_s25 = ssub.s32 %s3274_s19, %s4073_s22  ;;  %p28_p3 = scmp.ge.s32.totalorder %s4075_s23, 2 }
   0x9   : > { %p2518_p4 = scmp.ge.s32.totalorder %s3282_s21, 1  ;;  %p3355_p5 = por %p135_p2, %p134_p1 }
   0xa   : > { %p176_p6 = scmp.lt.s32.totalorder %s3282_s21, 5  ;;  %s4077_s23 = smov (%p28_p3, %s4075_s23), 0 }
   0xb   : > { %s119_s27 = ssub.s32 %s3278_s20, %s4077_s23  ;;  %s124_s29 = sadd.s32 1, %s3262_s16 }
   0xc   : > { %p177_p7 = pnand %p2518_p4, %p176_p6  ;;  %s121_s28 = sor.u32 %s120_s25, %s119_s27 }
   0xd   : > { %p122_p8 = scmp.eq.s32.totalorder %s121_s28, 0  ;;  %p201_p9 = scmp.lt.s32.totalorder (!%p177_p7), %s3270_s18, 1 }
   0xe   : > { %180 = sbr.rel (%p177_p7) target bundleno = 539 (0x21b), region = 36 }
   0xf   : > { %s3366_s30 = scalar_select %p122_p8, %s3262_s16, %s124_s29  }
  0x10   : > { %s2522_s12 = smul.u32 (!%p177_p7), 192, %s3266_s17  ;;  %s198_s29 = sand.u32 (!%p177_p7), 1, %s3258_s15  }
  0x11   : > { %s2519_s5 = sshll.u32 (!%p177_p7), %s198_s29, 7 }
  0x12   : > { %s3998_s6 = scalar_lea.vmem (!%p177_p7), [#allocation2], %s2519_s5 }
  0x13   : > { %v2523_v0 = vld [vmem:[%s4061_s1 + $0x8] sm:$0xff]  ;;  %v225_v1 = vld [vmem:[%s4061_s1] sm:$0xff]  ;;  %v2556_v2 = vld [vmem:[%s4061_s1 + $0x10] sm:$0xff]  ;;  %s202_s11 = scalar_select %p201_p9, %s3270_s18, 1  ;;  %vm244_vm0 = vcmask 64512  }
  0x14   : > { %3169 = vmatprep.subr.mxu1 %v2523_v0  ;;  %2935 = vmatprep.subr.mxu0 %v2523_v0  ;;  %v2591_v9 = vld [vmem:[%s4061_s1 + $0x18] sm:$0xff]  ;;  %v2624_v10 = vld [vmem:[%s4061_s1 + $0x20] sm:$0xff]  ;;  %v3482_v27 = vld [vmem:[%s4061_s1 + $0x28] sm:$0xff]  ;;  %s2778_s15 = sshll.u32 (%p3355_p5), %s3270_s18, 5 }
  0x15   : > { %3170 = vmatpush3.msra.mxu1 %v2523_v0  ;;  %2936 = vmatpush3.msra.mxu0 %v2523_v0  ;;  %s3171_s13 = smul.u32 432, %s202_s11  ;;  %v3487_v28 = vld [vmem:[%s4061_s1 + $0x30] sm:$0xff]  ;;  %v2725_v55 = vld [vmem:[%s4061_s1 + $0x38] sm:$0xff]  ;;  %v2758_v56 = vld [vmem:[%s4061_s1 + $0x40] sm:$0xff]  ;;  %s2344_s26 = sadd.s32 (%p3355_p5), %s3266_s17, %s2778_s15 }
  0x16   : > { %2961 = vmatprep.subr.mxu1 %v225_v1  ;;  %2987 = vmatprep.subr.mxu0 %v2556_v2  ;;  %s2779_s7 = sshll.u32 (%p3355_p5), %s2344_s26, 3 }
  0x17   : > { %s205_s25 = scalar_lea.vmem %s4060_s0, %s3171_s13  ;;  %s2346_s10 = scalar_lea.vmem (%p3355_p5), %s4064_s4, %s2779_s7 }
  0x18   : > { %s3383_s27 = scalar_lea.vmem %s205_s25, %s2522_s12 }
  0x19   : > { %v226_v3 = vld [vmem:[%s3383_s27 + $0x1] sm:$0xff]  ;;  %v227_v5 = vld [vmem:[%s3383_s27 + $0x9] sm:$0xff]  ;;  %v3397_v7 = vld [vmem:[%s3383_s27 + $0x19] sm:$0xff] }
  0x1a   : > { %v3387_v4 = vld [vmem:[%s3383_s27 + $0x61] sm:$0xff]  ;;  %2937 = vmatprep.mubr.msk.f32.mxu0 %vm244_vm0, %v226_v3  ;;  %v3394_v6 = vld [vmem:[%s3383_s27 + $0x69] sm:$0xff]  ;;  %v3400_v8 = vld [vmem:[%s3383_s27 + $0x79] sm:$0xff] }
  0x1b   : > { %2949 = vmatprep.mubr.msk.f32.mxu1 %vm244_vm0, %v3387_v4  ;;  %2938 = vmatmul.mubr.msk.f32.vlgmr.msra.gmra.mxu0 %vm244_vm0, %v227_v5  ;;  %v3412_v11 = vld [vmem:[%s3383_s27 + $0x21] sm:$0xff]  ;;  %v3422_v13 = vld [vmem:[%s3383_s27 + $0x31] sm:$0xff]  ;;  %v3436_v15 = vld [vmem:[%s3383_s27 + $0x39] sm:$0xff] }
  0x1c   : > { %2950 = vmatmul.mubr.msk.f32.vlgmr.msra.gmra.mxu1 %vm244_vm0, %v3394_v6  ;;  %2988 = vmatpush3.msra.mxu0 %v2556_v2  ;;  %v3415_v12 = vld [vmem:[%s3383_s27 + $0x81] sm:$0xff]  ;;  %v3425_v14 = vld [vmem:[%s3383_s27 + $0x91] sm:$0xff]  ;;  %v3439_v16 = vld [vmem:[%s3383_s27 + $0x99] sm:$0xff] }
  0x1d   : > { %2962 = vmatpush3.msra.mxu1 %v225_v1  ;;  %2940 = vmatprep.mubr.msk.f32.mxu0 %vm244_vm0, %v3397_v7  ;;  %v3442_v17 = vld [vmem:[%s3383_s27 + $0x49] sm:$0xff]  ;;  %v3456_v19 = vld [vmem:[%s3383_s27 + $0x51] sm:$0xff]  ;;  %v209_v21 = vld [vmem:[%s3383_s27] sm:$0xff] }
  0x1e   : > { %2952 = vmatprep.mubr.msk.f32.mxu1 %vm244_vm0, %v3400_v8  ;;  %3013 = vmatprep.subr.mxu1 %v2591_v9  ;;  %v3445_v18 = vld [vmem:[%s3383_s27 + $0xa9] sm:$0xff]  ;;  %v3459_v20 = vld [vmem:[%s3383_s27 + $0xb1] sm:$0xff]  ;;  %v3475_v26 = vld [vmem:[%s3383_s27 + $0x1a] sm:$0xff] }
  0x1f   : > { %3039 = vmatprep.subr.mxu0 %v2624_v10  ;;  %2941 = vmatmul.mubr.msk.f32.gmra.mxu0 %vm244_vm0, %v3412_v11  ;;  %v631_v22 = vld [vmem:[%s3383_s27 + $0x2] sm:$0xff]  ;;  %v632_v24 = vld [vmem:[%s3383_s27 + $0xa] sm:$0xff]  ;;  %v3472_v25 = vld [vmem:[%s3383_s27 + $0x18] sm:$0xff] }
  0x20   : > { %2953 = vmatmul.mubr.msk.f32.gmra.mxu1 %vm244_vm0, %v3415_v12  ;;  %2943 = vmatprep.mubr.msk.f32.mxu0 %vm244_vm0, %v3422_v13  ;;  %v210_v23 = vld [vmem:[%s3383_s27 + $0x8] sm:$0xff]  ;;  %v212_v29 = vld [vmem:[%s3383_s27 + $0x20] sm:$0xff]  ;;  %v3498_v31 = vld [vmem:[%s3383_s27 + $0x30] sm:$0xff] }
  0x21   : > { %2955 = vmatprep.mubr.msk.f32.mxu1 %vm244_vm0, %v3425_v14  ;;  %v3491_v30 = vld [vmem:[%s3383_s27 + $0x22] sm:$0xff]  ;;  %v3501_v32 = vld [vmem:[%s3383_s27 + $0x32] sm:$0xff]  ;;  %v3516_v34 = vld [vmem:[%s3383_s27 + $0x3a] sm:$0xff] }
  0x22   : > { %v3513_v33 = vld [vmem:[%s3383_s27 + $0x38] sm:$0xff]  ;;  %v3519_v35 = vld [vmem:[%s3383_s27 + $0x48] sm:$0xff]  ;;  %v3533_v37 = vld [vmem:[%s3383_s27 + $0x50] sm:$0xff] }
  0x23   : > { %2944 = vmatmul.mubr.msk.f32.gmra.mxu0 %vm244_vm0, %v3436_v15  ;;  %v3522_v36 = vld [vmem:[%s3383_s27 + $0x4a] sm:$0xff]  ;;  %v3536_v38 = vld [vmem:[%s3383_s27 + $0x52] sm:$0xff]  ;;  %v3539_v39 = vld [vmem:[%s3383_s27 + $0x60] sm:$0xff] }
  0x24   : > { %2956 = vmatmul.mubr.msk.f32.gmra.mxu1 %vm244_vm0, %v3439_v16  ;;  %2946 = vmatprep.mubr.msk.f32.mxu0 %vm244_vm0, %v3442_v17  ;;  %v3542_v40 = vld [vmem:[%s3383_s27 + $0x62] sm:$0xff]  ;;  %v3556_v42 = vld [vmem:[%s3383_s27 + $0x6a] sm:$0xff]  ;;  %v3559_v43 = vld [vmem:[%s3383_s27 + $0x78] sm:$0xff] }
  0x25   : > { %2958 = vmatprep.mubr.msk.f32.mxu1 %vm244_vm0, %v3445_v18  ;;  %v3553_v41 = vld [vmem:[%s3383_s27 + $0x68] sm:$0xff]  ;;  %v3562_v44 = vld [vmem:[%s3383_s27 + $0x7a] sm:$0xff]  ;;  %v3579_v47 = vld [vmem:[%s3383_s27 + $0x90] sm:$0xff] }
  0x26   : > { %v3573_v45 = vld [vmem:[%s3383_s27 + $0x80] sm:$0xff]  ;;  %v3582_v48 = vld [vmem:[%s3383_s27 + $0x92] sm:$0xff]  ;;  %v3599_v51 = vld [vmem:[%s3383_s27 + $0xa8] sm:$0xff] }
  0x27   : > { %2947 = vmatmul.mubr.msk.f32.gmra.mxu0 %vm244_vm0, %v3456_v19  ;;  %v3576_v46 = vld [vmem:[%s3383_s27 + $0x82] sm:$0xff]  ;;  %v3593_v49 = vld [vmem:[%s3383_s27 + $0x98] sm:$0xff]  ;;  %v3602_v52 = vld [vmem:[%s3383_s27 + $0xaa] sm:$0xff] }
  0x28   : > { %2959 = vmatmul.mubr.msk.f32.gmra.mxu1 %vm244_vm0, %v3459_v20  ;;  %2989 = vmatprep.mubr.msk.f32.mxu0 %vm244_vm0, %v631_v22  ;;  %v3596_v50 = vld [vmem:[%s3383_s27 + $0x9a] sm:$0xff]  ;;  %v3613_v53 = vld [vmem:[%s3383_s27 + $0xb0] sm:$0xff]  ;;  %v2590_v59 = vld [vmem:[%s3383_s27 + $0xc8] sm:$0xff] }
  0x29   : > { %2963 = vmatprep.mubr.msk.f32.mxu1 %vm244_vm0, %v209_v21  ;;  %v3616_v54 = vld [vmem:[%s3383_s27 + $0xb2] sm:$0xff]  ;;  %v2589_v57 = vld [vmem:[%s3383_s27 + $0xc0] sm:$0xff]  ;;  %v3694_v60 = vld [vmem:[%s3383_s27 + $0xc9] sm:$0xff] }
  0x2a   : > { %v3683_v58 = vld [vmem:[%s3383_s27 + $0xc1] sm:$0xff]  ;;  %v2690_v62 = vld [vmem:[%s3383_s27 + $0xd8] sm:$0xff]  ;;  %v2656_v63 = vld [vmem:[%s3383_s27 + $0xca] sm:$0xff] }
  0x2b   : > { %2990 = vmatmul.mubr.msk.f32.vlgmr.msra.gmra.mxu0 %vm244_vm0, %v632_v24  ;;  %v2655_v61 = vld [vmem:[%s3383_s27 + $0xc2] sm:$0xff]  ;;  %v2723_v1 = vld [vmem:[%s3383_s27 + $0xd9] sm:$0xff] }
  0x2c   : > { %2964 = vmatmul.mubr.msk.f32.vlgmr.msra.gmra.mxu1 %vm244_vm0, %v210_v23  ;;  %3040 = vmatpush3.msra.mxu0 %v2624_v10  ;;  %v2691_v0 = vld [vmem:[%s3383_s27 + $0xe0] sm:$0xff] }
  0x2d   : > { %3014 = vmatpush3.msra.mxu1 %v2591_v9  ;;  %2966 = vmatprep.mubr.msk.f32.mxu1 %vm244_vm0, %v3472_v25  ;;  %v2756_v2 = vld [vmem:[%s3383_s27 + $0xda] sm:$0xff] }
  0x2e   : > { %2992 = vmatprep.mubr.msk.f32.mxu0 %vm244_vm0, %v3475_v26  ;;  %3065 = vmatprep.subr.mxu1 %v3482_v27  ;;  %v2724_v3 = vld [vmem:[%s3383_s27 + $0xe1] sm:$0xff] }
  0x2f   : > { %3091 = vmatprep.subr.mxu0 %v3487_v28  ;;  %2993 = vmatmul.mubr.msk.f32.gmra.mxu0 %vm244_vm0, %v3491_v30 }
  0x30   : > { %2967 = vmatmul.mubr.msk.f32.gmra.mxu1 %vm244_vm0, %v212_v29  ;;  %2995 = vmatprep.mubr.msk.f32.mxu0 %vm244_vm0, %v3501_v32 }
  0x31   : > { %2969 = vmatprep.mubr.msk.f32.mxu1 %vm244_vm0, %v3498_v31 }
  0x33   : > { %2996 = vmatmul.mubr.msk.f32.gmra.mxu0 %vm244_vm0, %v3516_v34 }
  0x34   : > { %2970 = vmatmul.mubr.msk.f32.gmra.mxu1 %vm244_vm0, %v3513_v33  ;;  %2998 = vmatprep.mubr.msk.f32.mxu0 %vm244_vm0, %v3522_v36 }
  0x35   : > { %2972 = vmatprep.mubr.msk.f32.mxu1 %vm244_vm0, %v3519_v35 }
  0x37   : > { %2999 = vmatmul.mubr.msk.f32.gmra.mxu0 %vm244_vm0, %v3536_v38 }
  0x38   : > { %2973 = vmatmul.mubr.msk.f32.gmra.mxu1 %vm244_vm0, %v3533_v37  ;;  %3001 = vmatprep.mubr.msk.f32.mxu0 %vm244_vm0, %v3542_v40 }
  0x39   : > { %2975 = vmatprep.mubr.msk.f32.mxu1 %vm244_vm0, %v3539_v39 }
  0x3b   : > { %3002 = vmatmul.mubr.msk.f32.gmra.mxu0 %vm244_vm0, %v3556_v42 }
  0x3c   : > { %2976 = vmatmul.mubr.msk.f32.gmra.mxu1 %vm244_vm0, %v3553_v41  ;;  %3004 = vmatprep.mubr.msk.f32.mxu0 %vm244_vm0, %v3562_v44 }
  0x3d   : > { %2978 = vmatprep.mubr.msk.f32.mxu1 %vm244_vm0, %v3559_v43 }
  0x3f   : > { %3005 = vmatmul.mubr.msk.f32.gmra.mxu0 %vm244_vm0, %v3576_v46 }
  0x40   : > { %2979 = vmatmul.mubr.msk.f32.gmra.mxu1 %vm244_vm0, %v3573_v45  ;;  %3007 = vmatprep.mubr.msk.f32.mxu0 %vm244_vm0, %v3582_v48 }
  0x41   : > { %2981 = vmatprep.mubr.msk.f32.mxu1 %vm244_vm0, %v3579_v47 }
  0x43   : > { %3008 = vmatmul.mubr.msk.f32.gmra.mxu0 %vm244_vm0, %v3596_v50 }
  0x44   : > { %2982 = vmatmul.mubr.msk.f32.gmra.mxu1 %vm244_vm0, %v3593_v49  ;;  %3010 = vmatprep.mubr.msk.f32.mxu0 %vm244_vm0, %v3602_v52 }
  0x45   : > { %2984 = vmatprep.mubr.msk.f32.mxu1 %vm244_vm0, %v3599_v51 }
  0x47   : > { %3011 = vmatmul.mubr.msk.f32.gmra.mxu0 %vm244_vm0, %v3616_v54 }
  0x48   : > { %2985 = vmatmul.mubr.msk.f32.gmra.mxu1 %vm244_vm0, %v3613_v53  ;;  %3041 = vmatprep.mubr.msk.f32.mxu0 %vm244_vm0, %v3397_v7 }
  0x49   : > { %3015 = vmatprep.mubr.msk.f32.mxu1 %vm244_vm0, %v3472_v25 }
  0x4b   : > { %3042 = vmatmul.mubr.msk.f32.vlgmr.msra.gmra.mxu0 %vm244_vm0, %v3412_v11 }
  0x4c   : > { %3016 = vmatmul.mubr.msk.f32.vlgmr.msra.gmra.mxu1 %vm244_vm0, %v212_v29  ;;  %3092 = vmatpush3.msra.mxu0 %v3487_v28 }
  0x4d   : > { %3066 = vmatpush3.msra.mxu1 %v3482_v27  ;;  %3018 = vmatprep.mubr.msk.f32.mxu1 %vm244_vm0, %v3498_v31 }
  0x4e   : > { %3044 = vmatprep.mubr.msk.f32.mxu0 %vm244_vm0, %v3422_v13  ;;  %3117 = vmatprep.subr.mxu1 %v2725_v55 }
  0x4f   : > { %3143 = vmatprep.subr.mxu0 %v2758_v56  ;;  %3045 = vmatmul.mubr.msk.f32.gmra.mxu0 %vm244_vm0, %v3436_v15 }
  0x50   : > { %3019 = vmatmul.mubr.msk.f32.gmra.mxu1 %vm244_vm0, %v3513_v33  ;;  %3047 = vmatprep.mubr.msk.f32.mxu0 %vm244_vm0, %v3442_v17 }
  0x51   : > { %3021 = vmatprep.mubr.msk.f32.mxu1 %vm244_vm0, %v3519_v35 }
  0x53   : > { %3048 = vmatmul.mubr.msk.f32.gmra.mxu0 %vm244_vm0, %v3456_v19 }
  0x54   : > { %3022 = vmatmul.mubr.msk.f32.gmra.mxu1 %vm244_vm0, %v3533_v37  ;;  %3050 = vmatprep.mubr.msk.f32.mxu0 %vm244_vm0, %v3387_v4 }
  0x55   : > { %3024 = vmatprep.mubr.msk.f32.mxu1 %vm244_vm0, %v3539_v39 }
  0x57   : > { %3051 = vmatmul.mubr.msk.f32.gmra.mxu0 %vm244_vm0, %v3394_v6 }
  0x58   : > { %3025 = vmatmul.mubr.msk.f32.gmra.mxu1 %vm244_vm0, %v3553_v41  ;;  %3053 = vmatprep.mubr.msk.f32.mxu0 %vm244_vm0, %v3400_v8 }
  0x59   : > { %3027 = vmatprep.mubr.msk.f32.mxu1 %vm244_vm0, %v3559_v43 }
  0x5b   : > { %3054 = vmatmul.mubr.msk.f32.gmra.mxu0 %vm244_vm0, %v3415_v12 }
  0x5c   : > { %3028 = vmatmul.mubr.msk.f32.gmra.mxu1 %vm244_vm0, %v3573_v45  ;;  %3056 = vmatprep.mubr.msk.f32.mxu0 %vm244_vm0, %v3425_v14 }
  0x5d   : > { %3030 = vmatprep.mubr.msk.f32.mxu1 %vm244_vm0, %v3579_v47 }
  0x5f   : > { %3057 = vmatmul.mubr.msk.f32.gmra.mxu0 %vm244_vm0, %v3439_v16 }
  0x60   : > { %3031 = vmatmul.mubr.msk.f32.gmra.mxu1 %vm244_vm0, %v3593_v49  ;;  %3059 = vmatprep.mubr.msk.f32.mxu0 %vm244_vm0, %v3445_v18 }
  0x61   : > { %3033 = vmatprep.mubr.msk.f32.mxu1 %vm244_vm0, %v3599_v51 }
  0x63   : > { %3060 = vmatmul.mubr.msk.f32.gmra.mxu0 %vm244_vm0, %v3459_v20 }
  0x64   : > { %3034 = vmatmul.mubr.msk.f32.gmra.mxu1 %vm244_vm0, %v3613_v53  ;;  %3062 = vmatprep.mubr.msk.f32.mxu0 %vm244_vm0, %v3683_v58 }
  0x65   : > { %3036 = vmatprep.mubr.msk.f32.mxu1 %vm244_vm0, %v2589_v57 }
  0x67   : > { %3063 = vmatmul.mubr.msk.f32.gmra.mxu0 %vm244_vm0, %v3694_v60 }
  0x68   : > { %3037 = vmatmul.mubr.msk.f32.gmra.mxu1 %vm244_vm0, %v2590_v59  ;;  %3093 = vmatprep.mubr.msk.f32.mxu0 %vm244_vm0, %v3498_v31 }
  0x69   : > { %3067 = vmatprep.mubr.msk.f32.mxu1 %vm244_vm0, %v3475_v26 }
  0x6b   : > { %3094 = vmatmul.mubr.msk.f32.vlgmr.msra.gmra.mxu0 %vm244_vm0, %v3513_v33 }
  0x6c   : > { %3068 = vmatmul.mubr.msk.f32.vlgmr.msra.gmra.mxu1 %vm244_vm0, %v3491_v30  ;;  %3144 = vmatpush3.msra.mxu0 %v2758_v56 }
  0x6d   : > { %3118 = vmatpush3.msra.mxu1 %v2725_v55  ;;  %3070 = vmatprep.mubr.msk.f32.mxu1 %vm244_vm0, %v3501_v32 }
  0x6e   : > { %3096 = vmatprep.mubr.msk.f32.mxu0 %vm244_vm0, %v3519_v35 }
  0x6f   : > { %3097 = vmatmul.mubr.msk.f32.gmra.mxu0 %vm244_vm0, %v3533_v37 }
  0x70   : > { %3071 = vmatmul.mubr.msk.f32.gmra.mxu1 %vm244_vm0, %v3516_v34  ;;  %3099 = vmatprep.mubr.msk.f32.mxu0 %vm244_vm0, %v3539_v39 }
  0x71   : > { %3073 = vmatprep.mubr.msk.f32.mxu1 %vm244_vm0, %v3522_v36 }
  0x73   : > { %3100 = vmatmul.mubr.msk.f32.gmra.mxu0 %vm244_vm0, %v3553_v41 }
  0x74   : > { %3074 = vmatmul.mubr.msk.f32.gmra.mxu1 %vm244_vm0, %v3536_v38  ;;  %3102 = vmatprep.mubr.msk.f32.mxu0 %vm244_vm0, %v3559_v43 }
  0x75   : > { %3076 = vmatprep.mubr.msk.f32.mxu1 %vm244_vm0, %v3542_v40 }
  0x77   : > { %3103 = vmatmul.mubr.msk.f32.gmra.mxu0 %vm244_vm0, %v3573_v45 }
  0x78   : > { %3077 = vmatmul.mubr.msk.f32.gmra.mxu1 %vm244_vm0, %v3556_v42  ;;  %3105 = vmatprep.mubr.msk.f32.mxu0 %vm244_vm0, %v3579_v47 }
  0x79   : > { %3079 = vmatprep.mubr.msk.f32.mxu1 %vm244_vm0, %v3562_v44 }
  0x7b   : > { %3106 = vmatmul.mubr.msk.f32.gmra.mxu0 %vm244_vm0, %v3593_v49 }
  0x7c   : > { %3080 = vmatmul.mubr.msk.f32.gmra.mxu1 %vm244_vm0, %v3576_v46  ;;  %3108 = vmatprep.mubr.msk.f32.mxu0 %vm244_vm0, %v3599_v51 }
  0x7d   : > { %3082 = vmatprep.mubr.msk.f32.mxu1 %vm244_vm0, %v3582_v48 }
  0x7f   : > { %3109 = vmatmul.mubr.msk.f32.gmra.mxu0 %vm244_vm0, %v3613_v53 }
  0x80   : > { %3083 = vmatmul.mubr.msk.f32.gmra.mxu1 %vm244_vm0, %v3596_v50  ;;  %3111 = vmatprep.mubr.msk.f32.mxu0 %vm244_vm0, %v2589_v57 }
  0x81   : > { %3085 = vmatprep.mubr.msk.f32.mxu1 %vm244_vm0, %v3602_v52 }
  0x83   : > { %3112 = vmatmul.mubr.msk.f32.gmra.mxu0 %vm244_vm0, %v2590_v59 }
  0x84   : > { %3086 = vmatmul.mubr.msk.f32.gmra.mxu1 %vm244_vm0, %v3616_v54  ;;  %3114 = vmatprep.mubr.msk.f32.mxu0 %vm244_vm0, %v2690_v62 }
  0x85   : > { %3088 = vmatprep.mubr.msk.f32.mxu1 %vm244_vm0, %v2655_v61 }
  0x87   : > { %3115 = vmatmul.mubr.msk.f32.gmra.mxu0 %vm244_vm0, %v2691_v0 }
  0x88   : > { %3089 = vmatmul.mubr.msk.f32.gmra.mxu1 %vm244_vm0, %v2656_v63  ;;  %3145 = vmatprep.mubr.msk.f32.mxu0 %vm244_vm0, %v3501_v32 }
  0x89   : > { %3119 = vmatprep.mubr.msk.f32.mxu1 %vm244_vm0, %v3422_v13 }
  0x8b   : > { %3146 = vmatmul.mubr.msk.f32.vlgmr.msra.gmra.mxu0 %vm244_vm0, %v3516_v34 }
  0x8c   : > { %3120 = vmatmul.mubr.msk.f32.vlgmr.msra.gmra.mxu1 %vm244_vm0, %v3436_v15  ;;  %3148 = vmatprep.mubr.msk.f32.mxu0 %vm244_vm0, %v3522_v36 }
  0x8d   : > { %3122 = vmatprep.mubr.msk.f32.mxu1 %vm244_vm0, %v3442_v17 }
  0x8f   : > { %3149 = vmatmul.mubr.msk.f32.gmra.mxu0 %vm244_vm0, %v3536_v38 }
  0x90   : > { %3123 = vmatmul.mubr.msk.f32.gmra.mxu1 %vm244_vm0, %v3456_v19  ;;  %3151 = vmatprep.mubr.msk.f32.mxu0 %vm244_vm0, %v3542_v40 }
  0x91   : > { %3125 = vmatprep.mubr.msk.f32.mxu1 %vm244_vm0, %v3387_v4  ;;  %v2757_v4 = vld [vmem:[%s3383_s27 + $0xe2] sm:$0xff] }
  0x93   : > { %3152 = vmatmul.mubr.msk.f32.gmra.mxu0 %vm244_vm0, %v3556_v42 }
  0x94   : > { %3126 = vmatmul.mubr.msk.f32.gmra.mxu1 %vm244_vm0, %v3394_v6  ;;  %3154 = vmatprep.mubr.msk.f32.mxu0 %vm244_vm0, %v3562_v44 }
  0x95   : > { %3128 = vmatprep.mubr.msk.f32.mxu1 %vm244_vm0, %v3400_v8 }
  0x97   : > { %3155 = vmatmul.mubr.msk.f32.gmra.mxu0 %vm244_vm0, %v3576_v46 }
  0x98   : > { %3129 = vmatmul.mubr.msk.f32.gmra.mxu1 %vm244_vm0, %v3415_v12  ;;  %3157 = vmatprep.mubr.msk.f32.mxu0 %vm244_vm0, %v3582_v48 }
  0x99   : > { %3131 = vmatprep.mubr.msk.f32.mxu1 %vm244_vm0, %v3425_v14 }
  0x9b   : > { %3158 = vmatmul.mubr.msk.f32.gmra.mxu0 %vm244_vm0, %v3596_v50 }
  0x9c   : > { %3132 = vmatmul.mubr.msk.f32.gmra.mxu1 %vm244_vm0, %v3439_v16  ;;  %3160 = vmatprep.mubr.msk.f32.mxu0 %vm244_vm0, %v3602_v52 }
  0x9d   : > { %3134 = vmatprep.mubr.msk.f32.mxu1 %vm244_vm0, %v3445_v18 }
  0x9f   : > { %3161 = vmatmul.mubr.msk.f32.gmra.mxu0 %vm244_vm0, %v3616_v54 }
  0xa0   : > { %3135 = vmatmul.mubr.msk.f32.gmra.mxu1 %vm244_vm0, %v3459_v20  ;;  %3163 = vmatprep.mubr.msk.f32.mxu0 %vm244_vm0, %v2655_v61 }
  0xa1   : > { %3137 = vmatprep.mubr.msk.f32.mxu1 %vm244_vm0, %v3683_v58 }
  0xa3   : > { %3164 = vmatmul.mubr.msk.f32.gmra.mxu0 %vm244_vm0, %v2656_v63 }
  0xa4   : > { %3138 = vmatmul.mubr.msk.f32.gmra.mxu1 %vm244_vm0, %v3694_v60  ;;  %3166 = vmatprep.mubr.msk.f32.mxu0 %vm244_vm0, %v2756_v2 }
  0xa5   : > { %3140 = vmatprep.mubr.msk.f32.mxu1 %vm244_vm0, %v2723_v1 }
  0xa7   : > { %3167 = vmatmul.mubr.msk.f32.gmra.mxu0 %vm244_vm0, %v2757_v4 }
  0xa8   : > { %3141 = vmatmul.mubr.msk.f32.gmra.mxu1 %vm244_vm0, %v2724_v3 }
  0xdb   : > { %v2939_v5 = vpop.f32.mrf.mxu0 }
  0xdc   : > { %v2951_v6 = vpop.f32.mrf.mxu1 }
  0xdd   : > { %v359_v7 = vpop.f32.mrf.mxu0 }
  0xde   : > { %v399_v8 = vpop.f32.mrf.mxu1 }
  0xdf   : > { %v2942_v9 = vpop.f32.mrf.mxu0 }
  0xe0   : > { %v2954_v10 = vpop.f32.mrf.mxu1 }
  0xe1   : > { %v369_v11 = vpop.f32.mrf.mxu0 }
  0xe2   : > { %v409_v12 = vpop.f32.mrf.mxu1 }
  0xe3   : > { %v2945_v13 = vpop.f32.mrf.mxu0 }
  0xe4   : > { %v2957_v14 = vpop.f32.mrf.mxu1 }
  0xe5   : > { %v379_v15 = vpop.f32.mrf.mxu0 }
  0xe6   : > { %v419_v16 = vpop.f32.mrf.mxu1 }
  0xe7   : > { %v2948_v17 = vpop.f32.mrf.mxu0 }
  0xe8   : > { %v2960_v18 = vpop.f32.mrf.mxu1 }
  0xe9   : > { %v389_v19 = vpop.f32.mrf.mxu0 }
  0xea   : > { %v3823_v20 = vpop.f32.mrf.mxu1 }
  0xeb   : > { %v2991_v22 = vpop.f32.mrf.mxu0 }
  0xec   : > { %v2965_v21 = vpop.f32.mrf.mxu1 }
  0xed   : > { %v558_v23 = vadd.f32 %v2965_v21, %v2939_v5  ;;  %v763_v25 = vpop.f32.mrf.mxu0 }
  0xee   : > { %v552_v24 = vpop.f32.mrf.mxu1 }
  0xef   : > { %v3825_v26 = vadd.f32 %v2991_v22, %v558_v23  ;;  %v553_v27 = vadd.f32 %v552_v24, %v359_v7  ;;  %v2994_v29 = vpop.f32.mrf.mxu0 }
  0xf0   : > { %v2968_v28 = vpop.f32.mrf.mxu1 }
  0xf1   : > { %v3827_v30 = vadd.f32 %v763_v25, %v553_v27  ;;  %v568_v31 = vadd.f32 %v2968_v28, %v2942_v9  ;;  %v773_v33 = vpop.f32.mrf.mxu0 }
  0xf2   : > { %v562_v32 = vpop.f32.mrf.mxu1 }
  0xf3   : > { %v845_v34 = vadd.f32 %v2994_v29, %v568_v31  ;;  %v563_v35 = vadd.f32 %v562_v32, %v369_v11  ;;  %v2997_v37 = vpop.f32.mrf.mxu0 }
  0xf4   : > { %v2971_v36 = vpop.f32.mrf.mxu1 }
  0xf5   : > { %v3829_v38 = vadd.f32 %v773_v33, %v563_v35  ;;  %v578_v39 = vadd.f32 %v2971_v36, %v2945_v13  ;;  %v783_v41 = vpop.f32.mrf.mxu0 }
  0xf6   : > { %v572_v40 = vpop.f32.mrf.mxu1 }
  0xf7   : > { %v847_v42 = vadd.f32 %v2997_v37, %v578_v39  ;;  %v573_v43 = vadd.f32 %v572_v40, %v379_v15  ;;  %v3000_v45 = vpop.f32.mrf.mxu0 }
  0xf8   : > { %v2974_v44 = vpop.f32.mrf.mxu1 }
  0xf9   : > { %v846_v46 = vadd.f32 %v783_v41, %v573_v43  ;;  %v588_v47 = vadd.f32 %v2974_v44, %v2948_v17  ;;  %v793_v49 = vpop.f32.mrf.mxu0 }
  0xfa   : > { %v582_v48 = vpop.f32.mrf.mxu1 }
  0xfb   : > { %v849_v50 = vadd.f32 %v3000_v45, %v588_v47  ;;  %v583_v51 = vadd.f32 %v582_v48, %v389_v19  ;;  %v3003_v53 = vpop.f32.mrf.mxu0 }
  0xfc   : > { %v2977_v52 = vpop.f32.mrf.mxu1 }
  0xfd   : > { %v848_v54 = vadd.f32 %v793_v49, %v583_v51  ;;  %v598_v55 = vadd.f32 %v2977_v52, %v2951_v6  ;;  %v803_v57 = vpop.f32.mrf.mxu0 }
  0xfe   : > { %v592_v56 = vpop.f32.mrf.mxu1 }
  0xff   : > { %v851_v58 = vadd.f32 %v3003_v53, %v598_v55  ;;  %v593_v59 = vadd.f32 %v592_v56, %v399_v8  ;;  %v3006_v61 = vpop.f32.mrf.mxu0 }
 0x100   : > { %v2980_v60 = vpop.f32.mrf.mxu1 }
 0x101   : > { %v850_v62 = vadd.f32 %v803_v57, %v593_v59  ;;  %v608_v63 = vadd.f32 %v2980_v60, %v2954_v10  ;;  %v813_v1 = vpop.f32.mrf.mxu0 }
 0x102   : > { %v602_v0 = vpop.f32.mrf.mxu1 }
 0x103   : > { %v853_v2 = vadd.f32 %v3006_v61, %v608_v63  ;;  %v603_v3 = vadd.f32 %v602_v0, %v409_v12  ;;  %v3009_v5 = vpop.f32.mrf.mxu0 }
 0x104   : > { %v2983_v4 = vpop.f32.mrf.mxu1 }
 0x105   : > { %v852_v7 = vadd.f32 %v813_v1, %v603_v3  ;;  %v618_v9 = vadd.f32 %v2983_v4, %v2957_v14  ;;  %v823_v13 = vpop.f32.mrf.mxu0 }
 0x106   : > { %v612_v11 = vpop.f32.mrf.mxu1 }
 0x107   : > { %v855_v15 = vadd.f32 %v3009_v5, %v618_v9  ;;  %v613_v6 = vadd.f32 %v612_v11, %v419_v16  ;;  %v3012_v19 = vpop.f32.mrf.mxu0 }
 0x108   : > { %v2986_v17 = vpop.f32.mrf.mxu1 }
 0x109   : > { %v854_v21 = vadd.f32 %v823_v13, %v613_v6  ;;  %v628_v8 = vadd.f32 %v2986_v17, %v2960_v18  ;;  %v833_v23 = vpop.f32.mrf.mxu0 }
 0x10a   : > { %v622_v22 = vpop.f32.mrf.mxu1 }
 0x10b   : > { %v857_v24 = vadd.f32 %v3012_v19, %v628_v8  ;;  %v623_v10 = vadd.f32 %v622_v22, %v3823_v20  ;;  %v3834_v12 = vpop.f32.mrf.mxu0 }
 0x10c   : > { %v3832_v25 = vpop.f32.mrf.mxu1 }
 0x10d   : > { %v856_v27 = vadd.f32 %v833_v23, %v623_v10  ;;  %v3838_v14 = vpop.f32.mrf.mxu0 }
 0x10e   : > { %v3836_v28 = vpop.f32.mrf.mxu1 }
 0x10f   : > { %v3046_v16 = vpop.f32.mrf.mxu0 }
 0x110   : > { %v3020_v29 = vpop.f32.mrf.mxu1 }
 0x111   : > { %v1075_v31 = vadd.f32 %v3020_v29, %v845_v34  ;;  %v3842_v18 = vpop.f32.mrf.mxu0 }
 0x112   : > { %v3840_v32 = vpop.f32.mrf.mxu1 }
 0x113   : > { %v3844_v33 = vadd.f32 %v3046_v16, %v1075_v31  ;;  %v3049_v20 = vpop.f32.mrf.mxu0 }
 0x114   : > { %v3023_v35 = vpop.f32.mrf.mxu1 }
 0x115   : > { %v1077_v36 = vadd.f32 %v3023_v35, %v847_v42  ;;  %v1240_v39 = vpop.f32.mrf.mxu0 }
 0x116   : > { %v1013_v37 = vpop.f32.mrf.mxu1 }
 0x117   : > { %v3846_v40 = vadd.f32 %v3049_v20, %v1077_v36  ;;  %v1076_v41 = vadd.f32 %v1013_v37, %v846_v46  ;;  %v3052_v44 = vpop.f32.mrf.mxu0 }
 0x118   : > { %v3026_v43 = vpop.f32.mrf.mxu1 }
 0x119   : > { %v3848_v45 = vadd.f32 %v1240_v39, %v1076_v41  ;;  %v1079_v47 = vadd.f32 %v3026_v43, %v849_v50  ;;  %v1250_v48 = vpop.f32.mrf.mxu0 }
 0x11a   : > { %v1023_v34 = vpop.f32.mrf.mxu1 }
 0x11b   : > { %v3850_v49 = vadd.f32 %v3052_v44, %v1079_v47  ;;  %v1078_v51 = vadd.f32 %v1023_v34, %v848_v54  ;;  %v3055_v53 = vpop.f32.mrf.mxu0 }
 0x11c   : > { %v3029_v52 = vpop.f32.mrf.mxu1 }
 0x11d   : > { %v3852_v55 = vadd.f32 %v1250_v48, %v1078_v51  ;;  %v1081_v42 = vadd.f32 %v3029_v52, %v851_v58  ;;  %v1260_v57 = vpop.f32.mrf.mxu0 }
 0x11e   : > { %v1033_v56 = vpop.f32.mrf.mxu1 }
 0x11f   : > { %v3854_v59 = vadd.f32 %v3055_v53, %v1081_v42  ;;  %v1080_v46 = vadd.f32 %v1033_v56, %v850_v62  ;;  %v3058_v61 = vpop.f32.mrf.mxu0 }
 0x120   : > { %v3032_v60 = vpop.f32.mrf.mxu1 }
 0x121   : > { %v3856_v63 = vadd.f32 %v1260_v57, %v1080_v46  ;;  %v1083_v50 = vadd.f32 %v3032_v60, %v853_v2  ;;  %v1270_v1 = vpop.f32.mrf.mxu0  ;;  %v1073_v57 = vadd.f32 %v3832_v25, %v3825_v26  ;;  %v1074_v26 = vadd.f32 %v3840_v32, %v3829_v38 }
 0x122   : > { %v1043_v0 = vpop.f32.mrf.mxu1 }
 0x123   : > { %v3858_v3 = vadd.f32 %v3058_v61, %v1083_v50  ;;  %v1082_v54 = vadd.f32 %v1043_v0, %v852_v7  ;;  %v3061_v5 = vpop.f32.mrf.mxu0  ;;  %v1072_v61 = vadd.f32 %v3836_v28, %v3827_v30 }
 0x124   : > { %v3035_v4 = vpop.f32.mrf.mxu1 }
 0x125   : > { %v3860_v9 = vadd.f32 %v1270_v1, %v1082_v54  ;;  %v1085_v58 = vadd.f32 %v3035_v4, %v855_v15  ;;  %v1280_v13 = vpop.f32.mrf.mxu0  ;;  %v1300_v1 = vadd.f32 %v3834_v12, %v1073_v57  ;;  %v1301_v12 = vadd.f32 %v3842_v18, %v1074_v26 }
 0x126   : > { %v1053_v11 = vpop.f32.mrf.mxu1 }
 0x127   : > { %v3862_v6 = vadd.f32 %v3061_v5, %v1085_v58  ;;  %v1084_v62 = vadd.f32 %v1053_v11, %v854_v21  ;;  %v3064_v19 = vpop.f32.mrf.mxu0  ;;  %v1299_v5 = vadd.f32 %v3838_v14, %v1072_v61 }
 0x128   : > { %v3038_v17 = vpop.f32.mrf.mxu1 }
 0x129   : > { %v3864_v8 = vadd.f32 %v1280_v13, %v1084_v62  ;;  %v1087_v2 = vadd.f32 %v3038_v17, %v857_v24  ;;  %v1290_v23 = vpop.f32.mrf.mxu0 }
 0x12a   : > { %v1063_v22 = vpop.f32.mrf.mxu1 }
 0x12b   : > { %v3866_v10 = vadd.f32 %v3064_v19, %v1087_v2  ;;  %v1086_v7 = vadd.f32 %v1063_v22, %v856_v27  ;;  %v3095_v16 = vpop.f32.mrf.mxu0 }
 0x12c   : > { %v3069_v29 = vpop.f32.mrf.mxu1 }
 0x12d   : > { %v3868_v31 = vadd.f32 %v1290_v23, %v1086_v7  ;;  %v1677_v35 = vpop.f32.mrf.mxu0  ;;  %v1527_v25 = vadd.f32 %v3069_v29, %v1300_v1 }
 0x12e   : > { %v1447_v15 = vpop.f32.mrf.mxu1 }
 0x12f   : > { %v3098_v36 = vpop.f32.mrf.mxu0  ;;  %v1526_v30 = vadd.f32 %v1447_v15, %v1299_v5  ;;  %v1757_v62 = vadd.f32 %v3095_v16, %v1527_v25  ;;  %v3925_v15 = vld [vmem:[%s4062_s2] ss:$0 sm:$0xff] }
 0x130   : > { %v3072_v20 = vpop.f32.mrf.mxu1 }
 0x131   : > { %v1687_v21 = vpop.f32.mrf.mxu0  ;;  %v1529_v17 = vadd.f32 %v3072_v20, %v3844_v33  ;;  %v1756_v2 = vadd.f32 %v1677_v35, %v1526_v30 }
 0x132   : > { %v1457_v37 = vpop.f32.mrf.mxu1 }
 0x133   : > { %v3870_v41 = vpop.f32.mrf.mxu0  ;;  %v1528_v22 = vadd.f32 %v1457_v37, %v1301_v12  ;;  %v1759_v57 = vadd.f32 %v3098_v36, %v1529_v17 }
 0x134   : > { %v3075_v39 = vpop.f32.mrf.mxu1 }
 0x135   : > { %v1697_v24 = vpop.f32.mrf.mxu0  ;;  %v1758_v16 = vadd.f32 %v1687_v21, %v1528_v22  ;;  %v1531_v36 = vadd.f32 %v3075_v39, %v3846_v40 }
 0x136   : > { %v1467_v43 = vpop.f32.mrf.mxu1 }
 0x137   : > { %v3874_v47 = vpop.f32.mrf.mxu0  ;;  %v1530_v33 = vadd.f32 %v1467_v43, %v3848_v45  ;;  %v1761_v40 = vadd.f32 %v3870_v41, %v1531_v36 }
 0x138   : > { %v3872_v44 = vpop.f32.mrf.mxu1 }
 0x139   : > { %v3878_v34 = vpop.f32.mrf.mxu0  ;;  %v1760_v21 = vadd.f32 %v1697_v24, %v1530_v33 }
 0x13a   : > { %v3876_v27 = vpop.f32.mrf.mxu1 }
 0x13b   : > { %v3882_v51 = vpop.f32.mrf.mxu0 }
 0x13c   : > { %v3880_v48 = vpop.f32.mrf.mxu1 }
 0x13d   : > { %v3886_v53 = vpop.f32.mrf.mxu0 }
 0x13e   : > { %v3884_v52 = vpop.f32.mrf.mxu1 }
 0x13f   : > { %v3890_v56 = vpop.f32.mrf.mxu0 }
 0x140   : > { %v3888_v42 = vpop.f32.mrf.mxu1 }
 0x141   : > { %v3896_v60 = vpop.f32.mrf.mxu0 }
 0x142   : > { %v3894_v46 = vpop.f32.mrf.mxu1 }
 0x143   : > { %v3902_v0 = vpop.f32.mrf.mxu0 }
 0x144   : > { %v3900_v50 = vpop.f32.mrf.mxu1 }
 0x145   : > { %v3907_v4 = vpop.f32.mrf.mxu0 }
 0x146   : > { %v3905_v54 = vpop.f32.mrf.mxu1 }
 0x147   : > { %v3914_v11 = vpop.f32.mrf.mxu0 }
 0x148   : > { %v3912_v58 = vpop.f32.mrf.mxu1 }
 0x149   : > { %v3918_v13 = vpop.f32.mrf.mxu0 }
 0x14a   : > { %v3916_v28 = vpop.f32.mrf.mxu1 }
 0x14b   : > { %v3147_v14 = vpop.f32.mrf.mxu0 }
 0x14c   : > { %v3121_v19 = vpop.f32.mrf.mxu1 }
 0x14d   : > { %v1984_v38 = vadd.f32 %v3121_v19, %v1757_v62  ;;  %v2131_v23 = vpop.f32.mrf.mxu0  ;;  %v3934_v62 = vld [vmem:[%s4063_s3] ss:$0 sm:$0xff] }
 0x14e   : > { %v1904_v32 = vpop.f32.mrf.mxu1 }
 0x14f   : > { %v2211_v7 = vadd.f32 %v3147_v14, %v1984_v38  ;;  %v1983_v29 = vadd.f32 %v1904_v32, %v1756_v2  ;;  %v3150_v18 = vpop.f32.mrf.mxu0 }
 0x150   : > { %v3124_v61 = vpop.f32.mrf.mxu1 }
 0x151   : > { %v2210_v20 = vadd.f32 %v2131_v23, %v1983_v29  ;;  %v1986_v1 = vadd.f32 %v3124_v61, %v1759_v57  ;;  %v2141_v37 = vpop.f32.mrf.mxu0  ;;  %v2234_v5 = vmul.f32 %v3925_v15, %v2211_v7  ;;  %v1532_v23 = vadd.f32 %v3876_v27, %v3852_v55 }
 0x152   : > { %v1914_v35 = vpop.f32.mrf.mxu1 }
 0x153   : > { %v1985_v26 = vadd.f32 %v1914_v35, %v1758_v16  ;;  %v2233_v25 = vmul.f32 %v3925_v15, %v2210_v20  ;;  %v3153_v12 = vpop.f32.mrf.mxu0  ;;  %v2213_v17 = vadd.f32 %v3150_v18, %v1986_v1  ;;  %v2257_v38 = vadd.f32 %v3934_v62, %v2234_v5 }
 0x154   : > { %v3127_v30 = vpop.f32.mrf.mxu1  ;;  %v1533_v18 = vadd.f32 %v3872_v44, %v3850_v49  ;;  %v1762_v41 = vadd.f32 %v3878_v34, %v1532_v23 }
 0x155   : > { %v2212_v45 = vadd.f32 %v2141_v37, %v1985_v26  ;;  %v2256_v43 = vadd.f32 %v3934_v62, %v2233_v25  ;;  %v2151_v32 = vpop.f32.mrf.mxu0  ;;  %v1988_v24 = vadd.f32 %v3127_v30, %v1761_v40  ;;  %v2236_v7 = vmul.f32 %v3925_v15, %v2213_v17 }
 0x156   : > { %v1924_v19 = vpop.f32.mrf.mxu1  ;;  %v2273_v57 = vmax.f32 %v2257_v38, 0.0  ;;  %v1763_v37 = vadd.f32 %v3874_v47, %v1533_v18  ;;  %v1534_v25 = vadd.f32 %v3884_v52, %v3856_v63  ;;  %v1536_v38 = vadd.f32 %v3894_v46, %v3860_v9 }
 0x157   : > { %v2235_v14 = vmul.f32 %v3925_v15, %v2212_v45  ;;  %v1987_v2 = vadd.f32 %v1924_v19, %v1760_v21  ;;  %v2272_v22 = vmax.f32 %v2256_v43, 0.0  ;;  %v3156_v33 = vpop.f32.mrf.mxu0  ;;  %v2215_v20 = vadd.f32 %v3153_v12, %v1988_v24 }
 0x158   : > { %v3130_v39 = vpop.f32.mrf.mxu1  ;;  %v2259_v35 = vadd.f32 %v3934_v62, %v2236_v7  ;;  %v1535_v12 = vadd.f32 %v3880_v48, %v3854_v59  ;;  %v1764_v47 = vadd.f32 %v3886_v53, %v1534_v25 }
 0x159   : > { %2288 = vxpose.xlu0.b32.start [1/16] %v2272_v22, 128  ;;  %v2214_v29 = vadd.f32 %v2151_v32, %v1987_v2  ;;  %v2258_v61 = vadd.f32 %v3934_v62, %v2235_v14  ;;  %v2161_v26 = vpop.f32.mrf.mxu0  ;;  %v1990_v49 = vadd.f32 %v3130_v39, %v1763_v37  ;;  %v2238_v44 = vmul.f32 %v3925_v15, %v2215_v20 }
 0x15a   : > { %v1934_v16 = vpop.f32.mrf.mxu1  ;;  %v2275_v36 = vmax.f32 %v2259_v35, 0.0  ;;  %v1765_v14 = vadd.f32 %v3882_v51, %v1535_v12  ;;  %v1537_v32 = vadd.f32 %v3888_v42, %v3858_v3  ;;  %v1766_v51 = vadd.f32 %v3896_v60, %v1536_v38 }
 0x15b   : > { %v2237_v1 = vmul.f32 %v3925_v15, %v2214_v29  ;;  %v1989_v55 = vadd.f32 %v1934_v16, %v1762_v41  ;;  %v2274_v27 = vmax.f32 %v2258_v61, 0.0  ;;  %v3159_v45 = vpop.f32.mrf.mxu0  ;;  %v2217_v43 = vadd.f32 %v3156_v33, %v1990_v49 }
 0x15c   : > { %v3133_v5 = vpop.f32.mrf.mxu1  ;;  %v2261_v19 = vadd.f32 %v3934_v62, %v2238_v44  ;;  %v1767_v61 = vadd.f32 %v3890_v56, %v1537_v32  ;;  %v1538_v33 = vadd.f32 %v3905_v54, %v3864_v8  ;;  %v1540_v44 = vadd.f32 %v3916_v28, %v3868_v31 }
 0x15d   : > { %2289 = vxpose.xlu0.b32.cont [2/16] %v2273_v57, 128  ;;  %v2216_v34 = vadd.f32 %v2161_v26, %v1989_v55  ;;  %v2260_v30 = vadd.f32 %v3934_v62, %v2237_v1  ;;  %v2171_v22 = vpop.f32.mrf.mxu0  ;;  %v1992_v59 = vadd.f32 %v3133_v5, %v1765_v14  ;;  %v2240_v48 = vmul.f32 %v3925_v15, %v2217_v43 }
 0x15e   : > { %v1944_v21 = vpop.f32.mrf.mxu1  ;;  %v2277_v40 = vmax.f32 %v2261_v19, 0.0  ;;  %v1539_v1 = vadd.f32 %v3900_v50, %v3862_v6  ;;  %v1768_v56 = vadd.f32 %v3907_v4, %v1538_v33 }
 0x15f   : > { %v2239_v17 = vmul.f32 %v3925_v15, %v2216_v34  ;;  %v1991_v63 = vadd.f32 %v1944_v21, %v1764_v47  ;;  %v2276_v52 = vmax.f32 %v2260_v30, 0.0  ;;  %v3162_v24 = vpop.f32.mrf.mxu0  ;;  %v2219_v7 = vadd.f32 %v3159_v45, %v1992_v59 }
 0x160   : > { %v3136_v2 = vpop.f32.mrf.mxu1  ;;  %v2263_v57 = vadd.f32 %v3934_v62, %v2240_v48  ;;  %v1769_v26 = vadd.f32 %v3902_v0, %v1539_v1  ;;  %v1541_v21 = vadd.f32 %v3912_v58, %v3866_v10  ;;  %v1770_v0 = vadd.f32 %v3918_v13, %v1540_v44 }
 0x161   : > { %2290 = vxpose.xlu0.b32.cont [3/16] %v2274_v27, 128  ;;  %v2218_v53 = vadd.f32 %v2171_v22, %v1991_v63  ;;  %v2262_v39 = vadd.f32 %v3934_v62, %v2239_v17  ;;  %v2181_v16 = vpop.f32.mrf.mxu0  ;;  %v1994_v3 = vadd.f32 %v3136_v2, %v1767_v61  ;;  %v2242_v42 = vmul.f32 %v3925_v15, %v2219_v7 }
 0x162   : > { %v1954_v23 = vpop.f32.mrf.mxu1  ;;  %v2279_v41 = vmax.f32 %v2263_v57, 0.0  ;;  %v1771_v63 = vadd.f32 %v3914_v11, %v1541_v21 }
 0x163   : > { %v2241_v29 = vmul.f32 %v3925_v15, %v2218_v53  ;;  %v1993_v9 = vadd.f32 %v1954_v23, %v1766_v51  ;;  %v2278_v46 = vmax.f32 %v2262_v39, 0.0  ;;  %v3165_v27 = vpop.f32.mrf.mxu0  ;;  %v2221_v35 = vadd.f32 %v3162_v24, %v1994_v3 }
 0x164   : > { %v3139_v18 = vpop.f32.mrf.mxu1  ;;  %v2265_v5 = vadd.f32 %v3934_v62, %v2242_v42 }
 0x165   : > { %2291 = vxpose.xlu0.b32.cont [4/16] %v2275_v36, 128  ;;  %v2220_v60 = vadd.f32 %v2181_v16, %v1993_v9  ;;  %v2264_v20 = vadd.f32 %v3934_v62, %v2241_v29  ;;  %v2191_v49 = vpop.f32.mrf.mxu0  ;;  %v1996_v6 = vadd.f32 %v3139_v18, %v1769_v26  ;;  %v2244_v50 = vmul.f32 %v3925_v15, %v2221_v35 }
 0x166   : > { %v1964_v55 = vpop.f32.mrf.mxu1  ;;  %v2281_v34 = vmax.f32 %v2265_v5, 0.0 }
 0x167   : > { %v2243_v37 = vmul.f32 %v3925_v15, %v2220_v60  ;;  %v1995_v8 = vadd.f32 %v1964_v55, %v1768_v56  ;;  %v2280_v54 = vmax.f32 %v2264_v20, 0.0  ;;  %v3168_v12 = vpop.f32.mrf.mxu0  ;;  %v2223_v45 = vadd.f32 %v3165_v27, %v1996_v6 }
 0x168   : > { %v3142_v25 = vpop.f32.mrf.mxu1  ;;  %v2267_v43 = vadd.f32 %v3934_v62, %v2244_v50 }
 0x169   : > { %2292 = vxpose.xlu0.b32.cont [5/16] %v2276_v52, 128  ;;  %v2222_v4 = vadd.f32 %v2191_v49, %v1995_v8  ;;  %v2266_v36 = vadd.f32 %v3934_v62, %v2243_v37  ;;  %v2201_v17 = vpop.f32.mrf.mxu0  ;;  %v2246_v52 = vmul.f32 %v3925_v15, %v2223_v45  ;;  %v1998_v19 = vadd.f32 %v3142_v25, %v1771_v63 }
 0x16a   : > { %v1974_v30 = vpop.f32.mrf.mxu1  ;;  %v2283_v2 = vmax.f32 %v2267_v43, 0.0 }
 0x16b   : > { %v2245_v47 = vmul.f32 %v3925_v15, %v2222_v4  ;;  %v1997_v31 = vadd.f32 %v1974_v30, %v1770_v0  ;;  %v2282_v28 = vmax.f32 %v2266_v36, 0.0  ;;  %v2225_v58 = vadd.f32 %v3168_v12, %v1998_v19 }
 0x16c   : > { %v2269_v38 = vadd.f32 %v3934_v62, %v2246_v52 }
 0x16d   : > { %2293 = vxpose.xlu0.b32.cont [6/16] %v2277_v40, 128  ;;  %v2224_v14 = vadd.f32 %v2201_v17, %v1997_v31  ;;  %v2268_v10 = vadd.f32 %v3934_v62, %v2245_v47  ;;  %v2248_v59 = vmul.f32 %v3925_v15, %v2225_v58 }
 0x16e   : > { %v2285_v11 = vmax.f32 %v2269_v38, 0.0 }
 0x16f   : > { %v2247_v13 = vmul.f32 %v3925_v15, %v2224_v14  ;;  %v2284_v22 = vmax.f32 %v2268_v10, 0.0  ;;  %v2271_v40 = vadd.f32 %v3934_v62, %v2248_v59 }
 0x171   : > { %2294 = vxpose.xlu0.b32.cont [7/16] %v2278_v46, 128  ;;  %v2270_v48 = vadd.f32 %v3934_v62, %v2247_v13  ;;  %v2287_v39 = vmax.f32 %v2271_v40, 0.0 }
 0x173   : > { %v2286_v53 = vmax.f32 %v2270_v48, 0.0 }
 0x175   : > { %2295 = vxpose.xlu0.b32.cont [8/16] %v2279_v41, 128 }
 0x179   : > { %2296 = vxpose.xlu0.b32.cont [9/16] %v2280_v54, 128 }
 0x17d   : > { %2297 = vxpose.xlu0.b32.cont [10/16] %v2281_v34, 128 }
 0x181   : > { %2298 = vxpose.xlu0.b32.cont [11/16] %v2282_v28, 128 }
 0x185   : > { %2299 = vxpose.xlu0.b32.cont [12/16] %v2283_v2, 128 }
 0x189   : > { %2300 = vxpose.xlu0.b32.cont [13/16] %v2284_v22, 128 }
 0x18d   : > { %2301 = vxpose.xlu0.b32.cont [14/16] %v2285_v11, 128 }
 0x191   : > { %2302 = vxpose.xlu0.b32.cont [15/16] %v2286_v53, 128 }
 0x195   : > { %2303 = vxpose.xlu0.b32.end [16/16] %v2287_v39, 128 }
 0x1d5   : > { %v2304_v32 = vpop.trf.xlu0 }
 0x1d6   : > { %2320 = vst [vmem:[%s3998_s6] sm:$0xff] %v2304_v32 }
 0x1d9   : > { %v2305_v15 = vpop.trf.xlu0 }
 0x1da   : > { %2321 = vst [vmem:[%s3998_s6 + $0x8] sm:$0xff] %v2305_v15 }
 0x1dd   : > { %v2306_v62 = vpop.trf.xlu0  ;;  %v2405_v42 = vld [vmem:[%s3998_s6] sm:$0xff] (%p3355_p5) }
 0x1de   : > { %2322 = vst [vmem:[%s3998_s6 + $0x10] sm:$0xff] %v2306_v62  ;;  %2406 = vst [vmem:[%s2346_s10] sm:$0xff] (%p3355_p5), %v2405_v42 }
 0x1e1   : > { %v2307_v23 = vpop.trf.xlu0  ;;  %v2407_v60 = vld [vmem:[%s3998_s6 + $0x8] sm:$0xff] (%p3355_p5) }
 0x1e2   : > { %2323 = vst [vmem:[%s3998_s6 + $0x18] sm:$0xff] %v2307_v23  ;;  %2408 = vst [vmem:[%s2346_s10 + $0x10] sm:$0xff] (%p3355_p5), %v2407_v60 }
 0x1e5   : > { %v2308_v24 = vpop.trf.xlu0  ;;  %v2409_v41 = vld [vmem:[%s3998_s6 + $0x10] sm:$0xff] (%p3355_p5) }
 0x1e6   : > { %2324 = vst [vmem:[%s3998_s6 + $0x20] sm:$0xff] %v2308_v24  ;;  %2410 = vst [vmem:[%s2346_s10 + $0x20] sm:$0xff] (%p3355_p5), %v2409_v41 }
 0x1e9   : > { %v2309_v51 = vpop.trf.xlu0  ;;  %v2411_v20 = vld [vmem:[%s3998_s6 + $0x18] sm:$0xff] (%p3355_p5) }
 0x1ea   : > { %2325 = vst [vmem:[%s3998_s6 + $0x28] sm:$0xff] %v2309_v51  ;;  %2412 = vst [vmem:[%s2346_s10 + $0x30] sm:$0xff] (%p3355_p5), %v2411_v20 }
 0x1ed   : > { %v2310_v7 = vpop.trf.xlu0  ;;  %v2413_v1 = vld [vmem:[%s3998_s6 + $0x20] sm:$0xff] (%p3355_p5) }
 0x1ee   : > { %2326 = vst [vmem:[%s3998_s6 + $0x30] sm:$0xff] %v2310_v7  ;;  %2414 = vst [vmem:[%s2346_s10 + $0x40] sm:$0xff] (%p3355_p5), %v2413_v1 }
 0x1f1   : > { %v2311_v29 = vpop.trf.xlu0  ;;  %v2415_v55 = vld [vmem:[%s3998_s6 + $0x28] sm:$0xff] (%p3355_p5) }
 0x1f2   : > { %2327 = vst [vmem:[%s3998_s6 + $0x38] sm:$0xff] %v2311_v29  ;;  %2416 = vst [vmem:[%s2346_s10 + $0x50] sm:$0xff] (%p3355_p5), %v2415_v55 }
 0x1f5   : > { %v2312_v9 = vpop.trf.xlu0  ;;  %v2417_v27 = vld [vmem:[%s3998_s6 + $0x30] sm:$0xff] (%p3355_p5) }
 0x1f6   : > { %2328 = vst [vmem:[%s3998_s6 + $0x40] sm:$0xff] %v2312_v9  ;;  %2418 = vst [vmem:[%s2346_s10 + $0x60] sm:$0xff] (%p3355_p5), %v2417_v27 }
 0x1f9   : > { %v2313_v46 = vpop.trf.xlu0  ;;  %v2419_v56 = vld [vmem:[%s3998_s6 + $0x38] sm:$0xff] (%p3355_p5) }
 0x1fa   : > { %2329 = vst [vmem:[%s3998_s6 + $0x48] sm:$0xff] %v2313_v46  ;;  %2420 = vst [vmem:[%s2346_s10 + $0x70] sm:$0xff] (%p3355_p5), %v2419_v56 }
 0x1fd   : > { %v2314_v57 = vpop.trf.xlu0  ;;  %v2421_v35 = vld [vmem:[%s3998_s6 + $0x40] sm:$0xff] (%p3355_p5) }
 0x1fe   : > { %2330 = vst [vmem:[%s3998_s6 + $0x50] sm:$0xff] %v2314_v57  ;;  %2422 = vst [vmem:[%s2346_s10 + $0x80] sm:$0xff] (%p3355_p5), %v2421_v35 }
 0x201   : > { %v2315_v61 = vpop.trf.xlu0  ;;  %v2423_v37 = vld [vmem:[%s3998_s6 + $0x48] sm:$0xff] (%p3355_p5) }
 0x202   : > { %2331 = vst [vmem:[%s3998_s6 + $0x58] sm:$0xff] %v2315_v61  ;;  %2424 = vst [vmem:[%s2346_s10 + $0x90] sm:$0xff] (%p3355_p5), %v2423_v37 }
 0x205   : > { %v2316_v18 = vpop.trf.xlu0  ;;  %v2425_v8 = vld [vmem:[%s3998_s6 + $0x50] sm:$0xff] (%p3355_p5) }
 0x206   : > { %2332 = vst [vmem:[%s3998_s6 + $0x60] sm:$0xff] %v2316_v18  ;;  %2426 = vst [vmem:[%s2346_s10 + $0xa0] sm:$0xff] (%p3355_p5), %v2425_v8 }
 0x209   : > { %v2317_v16 = vpop.trf.xlu0  ;;  %v2427_v54 = vld [vmem:[%s3998_s6 + $0x58] sm:$0xff] (%p3355_p5) }
 0x20a   : > { %2333 = vst [vmem:[%s3998_s6 + $0x68] sm:$0xff] %v2317_v16  ;;  %2428 = vst [vmem:[%s2346_s10 + $0xb0] sm:$0xff] (%p3355_p5), %v2427_v54 }
 0x20d   : > { %v2318_v33 = vpop.trf.xlu0  ;;  %v2429_v5 = vld [vmem:[%s3998_s6 + $0x60] sm:$0xff] (%p3355_p5) }
 0x20e   : > { %2334 = vst [vmem:[%s3998_s6 + $0x70] sm:$0xff] %v2318_v33  ;;  %2342 = sbr.rel (!%p3355_p5) target bundleno = 539 (0x21b), region = 40  ;;  %2430 = vst [vmem:[%s2346_s10 + $0xc0] sm:$0xff] (%p3355_p5), %v2429_v5 }
 0x211   : > { %v2319_v3 = vpop.trf.xlu0  ;;  %v2431_v26 = vld [vmem:[%s3998_s6 + $0x68] sm:$0xff] (%p3355_p5) }
 0x212   : > { %2335 = vst [vmem:[%s3998_s6 + $0x78] sm:$0xff] %v2319_v3  ;;  %2432 = vst [vmem:[%s2346_s10 + $0xd0] sm:$0xff] (%p3355_p5), %v2431_v26 }
 0x215   : > { %v2433_v25 = vld [vmem:[%s3998_s6 + $0x70] sm:$0xff] }
 0x216   : > { %2434 = vst [vmem:[%s2346_s10 + $0xe0] sm:$0xff] %v2433_v25 }
 0x219   : > { %v2435_v49 = vld [vmem:[%s3998_s6 + $0x78] sm:$0xff] }
 0x21a   : > { %2436 = vst [vmem:[%s2346_s10 + $0xf0] sm:$0xff] %v2435_v49 }
 0x21b PF: > { %s14_s21 = sadd.s32 1, %s3282_s21   ;;  %s4066_s15 = smov %s3262_s16 }
 0x21c   : > { %p11_p10 = scmp.ge.s32.totalorder %s14_s21, 6   ;;  %s4067_s16 = smov %s3366_s30 }
 0x21d   : > { %s4068_s17 = smov %s3274_s19  ;;  %s4069_s18 = smov %s3278_s20 }
 0x21e   : > { %s4070_s19 = smov %s4073_s22  ;;  %s4071_s20 = smov %s4077_s23 }
 0x21f   :  { %13 = sbr.rel (!%p11_p10) target bundleno = 4 (0x4), region = 115 }

</bundles_post_ra>
